<compile_context>
chip_gen: v7x
topology: tpu7x:2x2x1
jax: 0.10.0
libtpu: 0.0.40
codegen_flags: <defaults>
</compile_context>

<pallas_src>
import functools

import numpy as np
import jax
import jax.numpy as jnp
from jax.experimental import pallas as pl
from jax.experimental.pallas import tpu as pltpu


def _round_up(x, m):
    return ((x + m - 1) // m) * m


# ----------------------------------------------------------------------------
# Pallas kernel
# ----------------------------------------------------------------------------
def _segmentator_kernel(bidx_ref, pos_ref, enc_tab_ref, w1p_ref,
                        w2_ref, b2_ref,
                        w3_ref, b3_ref,
                        w4_ref, b4_ref,
                        out_ref, *, num_classes):
    """One TM-row tile: select pre-folded layer-1 encoding row, run MLP, log_softmax.

    bidx_ref    : (TM, 1)    int32 graph id per point
    pos_ref     : (TM, 3)    bf16 point coordinates
    enc_tab_ref : (Bp, H1)   f32  pre-folded  encoding @ W1[:enc] + b1  per graph
    w1p_ref     : (3, H1)    f32  pos rows of W1 (bf16-rounded values)
    w*_ref      : resident bf16 weights; b*_ref resident f32 biases (1, H)
    out_ref     : (TM, Kpad) bf16 log-probabilities (padded class lanes ~ -1e30)
    """
    tm = bidx_ref.shape[0]
    num_graphs = enc_tab_ref.shape[0]

    # --- layer 1, encoding half: exact row-select via one-hot matmul (K = Bp) ---
    gid = bidx_ref[...]                                                   # (TM, 1) i32
    graph_iota = jax.lax.broadcasted_iota(jnp.int32, (tm, num_graphs), 1)
    onehot = (graph_iota == gid).astype(jnp.float32)                      # (TM, Bp)
    h = jnp.dot(onehot, enc_tab_ref[...],
                preferred_element_type=jnp.float32)                       # (TM, H1) f32

    # --- layer 1, pos half: K=3 contraction on the VPU (broadcast multiply-adds) ---
    pos32 = pos_ref[...].astype(jnp.float32)                              # (TM, 3)
    w1p = w1p_ref[...]                                                    # (3, H1)
    h = h + pos32[:, 0:1] * w1p[0:1, :]
    h = h + pos32[:, 1:2] * w1p[1:2, :]
    h = h + pos32[:, 2:3] * w1p[2:3, :]
    h = jnp.maximum(h, 0.0)
    # TODO(synk): BatchNorm after each hidden Linear treated as eval-mode identity.

    # --- hidden layers (bf16 in, f32 accumulate) ------------------------------
    h = jnp.maximum(jnp.dot(h.astype(jnp.bfloat16), w2_ref[...],
                            preferred_element_type=jnp.float32) + b2_ref[...], 0.0)
    h = jnp.maximum(jnp.dot(h.astype(jnp.bfloat16), w3_ref[...],
                            preferred_element_type=jnp.float32) + b3_ref[...], 0.0)

    # --- last layer: Linear only (MLP(..., last=True) has no final activation) -
    logits = jnp.dot(h.astype(jnp.bfloat16), w4_ref[...],
                     preferred_element_type=jnp.float32) + b4_ref[...]    # (TM, Kpad)

    # --- numerically-stable log_softmax over the valid classes ----------------
    cls_iota = jax.lax.broadcasted_iota(jnp.int32, logits.shape, 1)
    valid = cls_iota < num_classes
    z = jnp.where(valid, logits, jnp.float32(-1e30))
    m = jnp.max(z, axis=-1, keepdims=True)
    e = jnp.where(valid, jnp.exp(z - m), 0.0)
    lse = jnp.log(jnp.sum(e, axis=-1, keepdims=True))
    out_ref[...] = (z - m - lse).astype(out_ref.dtype)                    # bf16 store


# ----------------------------------------------------------------------------
# Wrapper
# ----------------------------------------------------------------------------
def segmentator_forward(encoding, pos, batch, params, num_classes, *, tile_m=1024):
    """Pallas forward of Segmentator.  encoding:(B,C) pos:(N,3) batch:(N,) int."""
    (w1, b1), (w2, b2), (w3, b3), (w4, b4) = params
    n, pos_dim = pos.shape
    num_graphs, enc_dim = encoding.shape
    h1, h2, h3 = w1.shape[1], w2.shape[1], w3.shape[1]
    k = w4.shape[1]
    assert w1.shape[0] == enc_dim + pos_dim
    assert k == num_classes

    # Row tile: big (amortize per-step overhead) but keep >= 2 grid blocks so the
    # "parallel" grid axis can shard across v7x's 2 TensorCores.
    tm = min(int(tile_m), _round_up(max(1, (n + 1) // 2), 128))
    n_pad = _round_up(n, tm)                    # pad point rows to the tile size
    k_pad = _round_up(k, 128)                   # lane-dense output tile
    b_pad = _round_up(num_graphs, 8)            # sublane-friendly graph table
    grid = (n_pad // tm,)

    bidx = jnp.pad(batch.astype(jnp.int32), (0, n_pad - n)).reshape(n_pad, 1)
    pos_p = jnp.pad(pos.astype(jnp.float32),
                    ((0, n_pad - n), (0, 0))).astype(jnp.bfloat16)

    # Pre-fold layer 1's encoding half on the host (B x enc_dim x h1 -- negligible):
    #   enc_table[g] = bf16(encoding[g]) @ bf16(W1[:enc_dim])  (f32 acc)  + b1
    # onehot @ enc_table  ==  (onehot @ encoding) @ W1[:enc_dim] + b1, so the per-tile
    # encoding matmul disappears from the kernel.
    enc_table = jnp.dot(encoding.astype(jnp.bfloat16),
                        w1[:enc_dim].astype(jnp.bfloat16),
                        preferred_element_type=jnp.float32) + b1.astype(jnp.float32)
    enc_table = jnp.pad(enc_table, ((0, b_pad - num_graphs), (0, 0)))       # (Bp, H1) f32

    w1p = w1[enc_dim:].astype(jnp.bfloat16).astype(jnp.float32)             # (3, H1)
    w4p = jnp.pad(w4, ((0, 0), (0, k_pad - k))).astype(jnp.bfloat16)
    b4p = jnp.pad(b4, ((0, 0), (0, k_pad - k))).astype(jnp.float32)

    def row_spec(c):                                        # tiled over the point grid
        return pl.BlockSpec((tm, c), lambda i: (i, 0))

    def res_spec(shape):                                    # resident across the grid
        return pl.BlockSpec(shape, lambda i: (0, 0), pipeline_mode=pl.Buffered(1))

    out = pl.pallas_call(
        functools.partial(_segmentator_kernel, num_classes=k),
        out_shape=jax.ShapeDtypeStruct((n_pad, k_pad), jnp.bfloat16),
        grid=grid,
        in_specs=[
            row_spec(1),                         # batch ids
            row_spec(pos_dim),                   # pos
            res_spec((b_pad, h1)),               # pre-folded per-graph layer-1 table
            res_spec((pos_dim, h1)),             # pos rows of W1
            res_spec((h1, h2)), res_spec((1, h2)),
            res_spec((h2, h3)), res_spec((1, h3)),
            res_spec((h3, k_pad)), res_spec((1, k_pad)),
        ],
        out_specs=row_spec(k_pad),
        compiler_params=pltpu.CompilerParams(
            dimension_semantics=("parallel",),
            # 32 MB is safe on every generation (v7x has only 64 MiB VMEM per TC).
            vmem_limit_bytes=32 * 1024 * 1024),
    )(bidx, pos_p, enc_table, w1p,
      w2.astype(jnp.bfloat16), b2.astype(jnp.float32),
      w3.astype(jnp.bfloat16), b3.astype(jnp.float32),
      w4p, b4p)

    return out[:n, :k]


# ----------------------------------------------------------------------------
# Pure-JAX reference (mirrors the kernel's bf16-in / f32-accumulate numerics)
# ----------------------------------------------------------------------------
def segmentator_reference(encoding, pos, batch, params):
    (w1, b1), (w2, b2), (w3, b3), (w4, b4) = params

    def lin(x, w, b):
        return jnp.dot(x.astype(jnp.bfloat16), w.astype(jnp.bfloat16),
                       preferred_element_type=jnp.float32) + b

    enc_pw = encoding.astype(jnp.bfloat16)[batch].astype(jnp.float32)
    pos_f = pos.astype(jnp.bfloat16).astype(jnp.float32)
    x = jnp.concatenate([enc_pw, pos_f], axis=-1)
    h = jnp.maximum(lin(x, w1, b1), 0.0)
    h = jnp.maximum(lin(h, w2, b2), 0.0)
    h = jnp.maximum(lin(h, w3, b3), 0.0)
    logits = lin(h, w4, b4)
    return jax.nn.log_softmax(logits, axis=-1)


def init_mlp_params(key, dims):
    params = []
    for i in range(len(dims) - 1):
        key, kw = jax.random.split(key)
        w = jax.random.normal(kw, (dims[i], dims[i + 1]), jnp.float32) / np.sqrt(dims[i])
        b = jnp.zeros((1, dims[i + 1]), jnp.float32)
        params.append((w, b))
    return key, params


# ----------------------------------------------------------------------------
if __name__ == "__main__":
    num_graphs = 2          # graphs in the batch
    n_per = 100             # points per graph
    enc_dim = 128           # bottleneck encoding size from the encoder
    num_classes = 50        # ShapeNet part categories
    hidden = (128, 128, 128)

    N = num_graphs * n_per
    key = jax.random.PRNGKey(0)
    kenc, kpos, kparam = jax.random.split(key, 3)

    encoding = jax.random.normal(kenc, (num_graphs, enc_dim), jnp.float32)
    pos = jax.random.uniform(kpos, (N, 3), jnp.float32)
    batch = jnp.asarray(np.repeat(np.arange(num_graphs), n_per), jnp.int32)

    _, params = init_mlp_params(kparam, [enc_dim + 3, *hidden, num_classes])

    out = segmentator_forward(encoding, pos, batch, params, num_classes)
    out = jax.block_until_ready(out)

    assert out.shape == (N, num_classes), out.shape
    out_f32 = np.asarray(out, dtype=np.float32)
    assert np.isfinite(out_f32).all()
    # log_softmax rows must exponentiate to a probability distribution
    np.testing.assert_allclose(np.exp(out_f32).sum(axis=-1), 1.0, atol=1e-2)
    # match the pure-JAX reference (bf16 output -> ~3 decimal digits)
    ref = jax.block_until_ready(segmentator_reference(encoding, pos, batch, params))
    np.testing.assert_allclose(out_f32, np.asarray(ref), rtol=2e-2, atol=2e-2)

    print("KERNEL_OK")
</pallas_src>

<mosaic_0001>
module attributes {stable_mosaic.version = 11 : i64} {
  func.func @_segmentator_kernel(%arg0: i32, %arg1: memref<128x1xi32, #tpu.memory_space<vmem>>, %arg2: memref<128x3xbf16, #tpu.memory_space<vmem>>, %arg3: memref<8x128xf32, #tpu.memory_space<vmem>>, %arg4: memref<3x128xf32, #tpu.memory_space<vmem>>, %arg5: memref<128x128xbf16, #tpu.memory_space<vmem>>, %arg6: memref<1x128xf32, #tpu.memory_space<vmem>>, %arg7: memref<128x128xbf16, #tpu.memory_space<vmem>>, %arg8: memref<1x128xf32, #tpu.memory_space<vmem>>, %arg9: memref<128x128xbf16, #tpu.memory_space<vmem>>, %arg10: memref<1x128xf32, #tpu.memory_space<vmem>>, %arg11: memref<128x128xbf16, #tpu.memory_space<vmem>>) attributes {dimension_semantics = [#tpu.dimension_semantics<parallel>], iteration_bounds = array<i64: 2>, scalar_prefetch = 0 : i64, scratch_operands = 0 : i64, tpu.core_type = #tpu.core_type<tc>, window_params = [{transform_indices = @transform_0, window_bounds = array<i64: 128, 1>}, {transform_indices = @transform_1, window_bounds = array<i64: 128, 3>}, {pipeline_mode = #tpu.pipeline_mode<synchronous>, transform_indices = @transform_2, window_bounds = array<i64: 8, 128>}, {pipeline_mode = #tpu.pipeline_mode<synchronous>, transform_indices = @transform_3, window_bounds = array<i64: 3, 128>}, {pipeline_mode = #tpu.pipeline_mode<synchronous>, transform_indices = @transform_4, window_bounds = array<i64: 128, 128>}, {pipeline_mode = #tpu.pipeline_mode<synchronous>, transform_indices = @transform_5, window_bounds = array<i64: 1, 128>}, {pipeline_mode = #tpu.pipeline_mode<synchronous>, transform_indices = @transform_6, window_bounds = array<i64: 128, 128>}, {pipeline_mode = #tpu.pipeline_mode<synchronous>, transform_indices = @transform_7, window_bounds = array<i64: 1, 128>}, {pipeline_mode = #tpu.pipeline_mode<synchronous>, transform_indices = @transform_8, window_bounds = array<i64: 128, 128>}, {pipeline_mode = #tpu.pipeline_mode<synchronous>, transform_indices = @transform_9, window_bounds = array<i64: 1, 128>}, {transform_indices = @transform_10, window_bounds = array<i64: 128, 128>}]} {
    %c0 = arith.constant 0 : index
    %c0_0 = arith.constant 0 : index
    %0 = vector.load %arg1[%c0, %c0_0] : memref<128x1xi32, #tpu.memory_space<vmem>>, vector<128x1xi32>
    %1 = tpu.iota {dimensions = array<i32: 1>} : vector<128x8xi32>
    %2 = vector.broadcast %0 : vector<128x1xi32> to vector<128x8xi32>
    %3 = arith.cmpi eq, %1, %2 : vector<128x8xi32>
    %4 = arith.extui %3 : vector<128x8xi1> to vector<128x8xi32>
    %5 = arith.sitofp %4 : vector<128x8xi32> to vector<128x8xf32>
    %c0_1 = arith.constant 0 : index
    %c0_2 = arith.constant 0 : index
    %6 = vector.load %arg3[%c0_1, %c0_2] : memref<8x128xf32, #tpu.memory_space<vmem>>, vector<8x128xf32>
    %cst = arith.constant dense<0.000000e+00> : vector<128x128xf32>
    %7 = tpu.matmul %5, %6, %cst {dimension_numbers = #tpu.dot_dimension_numbers<[1], [0], [0], [1], [0, 0, 1, 1], [], []>} : vector<128x8xf32>, vector<8x128xf32>, vector<128x128xf32> -> vector<128x128xf32>
    %c0_3 = arith.constant 0 : index
    %c0_4 = arith.constant 0 : index
    %8 = vector.load %arg2[%c0_3, %c0_4] : memref<128x3xbf16, #tpu.memory_space<vmem>>, vector<128x3xbf16>
    %9 = arith.extf %8 : vector<128x3xbf16> to vector<128x3xf32>
    %c0_5 = arith.constant 0 : index
    %c0_6 = arith.constant 0 : index
    %10 = vector.load %arg4[%c0_5, %c0_6] : memref<3x128xf32, #tpu.memory_space<vmem>>, vector<3x128xf32>
    %11 = vector.extract_strided_slice %9 {offsets = [0, 0], sizes = [128, 1], strides = [1, 1]} : vector<128x3xf32> to vector<128x1xf32>
    %12 = vector.extract_strided_slice %10 {offsets = [0, 0], sizes = [1, 128], strides = [1, 1]} : vector<3x128xf32> to vector<1x128xf32>
    %13 = vector.broadcast %11 : vector<128x1xf32> to vector<128x128xf32>
    %14 = vector.broadcast %12 : vector<1x128xf32> to vector<128x128xf32>
    %15 = arith.mulf %13, %14 : vector<128x128xf32>
    %16 = arith.addf %7, %15 : vector<128x128xf32>
    %17 = vector.extract_strided_slice %9 {offsets = [0, 1], sizes = [128, 1], strides = [1, 1]} : vector<128x3xf32> to vector<128x1xf32>
    %18 = vector.extract_strided_slice %10 {offsets = [1, 0], sizes = [1, 128], strides = [1, 1]} : vector<3x128xf32> to vector<1x128xf32>
    %19 = vector.broadcast %17 : vector<128x1xf32> to vector<128x128xf32>
    %20 = vector.broadcast %18 : vector<1x128xf32> to vector<128x128xf32>
    %21 = arith.mulf %19, %20 : vector<128x128xf32>
    %22 = arith.addf %16, %21 : vector<128x128xf32>
    %23 = vector.extract_strided_slice %9 {offsets = [0, 2], sizes = [128, 1], strides = [1, 1]} : vector<128x3xf32> to vector<128x1xf32>
    %24 = vector.extract_strided_slice %10 {offsets = [2, 0], sizes = [1, 128], strides = [1, 1]} : vector<3x128xf32> to vector<1x128xf32>
    %25 = vector.broadcast %23 : vector<128x1xf32> to vector<128x128xf32>
    %26 = vector.broadcast %24 : vector<1x128xf32> to vector<128x128xf32>
    %27 = arith.mulf %25, %26 : vector<128x128xf32>
    %28 = arith.addf %22, %27 : vector<128x128xf32>
    %cst_7 = arith.constant 0.000000e+00 : f32
    %29 = vector.broadcast %cst_7 : f32 to vector<128x128xf32>
    %30 = arith.maximumf %28, %29 : vector<128x128xf32>
    %31 = arith.truncf %30 : vector<128x128xf32> to vector<128x128xbf16>
    %c0_8 = arith.constant 0 : index
    %c0_9 = arith.constant 0 : index
    %32 = vector.load %arg5[%c0_8, %c0_9] : memref<128x128xbf16, #tpu.memory_space<vmem>>, vector<128x128xbf16>
    %cst_10 = arith.constant dense<0.000000e+00> : vector<128x128xf32>
    %33 = tpu.matmul %31, %32, %cst_10 {dimension_numbers = #tpu.dot_dimension_numbers<[1], [0], [0], [1], [0, 0, 1, 1], [], []>} : vector<128x128xbf16>, vector<128x128xbf16>, vector<128x128xf32> -> vector<128x128xf32>
    %c0_11 = arith.constant 0 : index
    %c0_12 = arith.constant 0 : index
    %34 = vector.load %arg6[%c0_11, %c0_12] : memref<1x128xf32, #tpu.memory_space<vmem>>, vector<1x128xf32>
    %35 = vector.broadcast %34 : vector<1x128xf32> to vector<128x128xf32>
    %36 = arith.addf %33, %35 : vector<128x128xf32>
    %cst_13 = arith.constant 0.000000e+00 : f32
    %37 = vector.broadcast %cst_13 : f32 to vector<128x128xf32>
    %38 = arith.maximumf %36, %37 : vector<128x128xf32>
    %39 = arith.truncf %38 : vector<128x128xf32> to vector<128x128xbf16>
    %c0_14 = arith.constant 0 : index
    %c0_15 = arith.constant 0 : index
    %40 = vector.load %arg7[%c0_14, %c0_15] : memref<128x128xbf16, #tpu.memory_space<vmem>>, vector<128x128xbf16>
    %cst_16 = arith.constant dense<0.000000e+00> : vector<128x128xf32>
    %41 = tpu.matmul %39, %40, %cst_16 {dimension_numbers = #tpu.dot_dimension_numbers<[1], [0], [0], [1], [0, 0, 1, 1], [], []>} : vector<128x128xbf16>, vector<128x128xbf16>, vector<128x128xf32> -> vector<128x128xf32>
    %c0_17 = arith.constant 0 : index
    %c0_18 = arith.constant 0 : index
    %42 = vector.load %arg8[%c0_17, %c0_18] : memref<1x128xf32, #tpu.memory_space<vmem>>, vector<1x128xf32>
    %43 = vector.broadcast %42 : vector<1x128xf32> to vector<128x128xf32>
    %44 = arith.addf %41, %43 : vector<128x128xf32>
    %cst_19 = arith.constant 0.000000e+00 : f32
    %45 = vector.broadcast %cst_19 : f32 to vector<128x128xf32>
    %46 = arith.maximumf %44, %45 : vector<128x128xf32>
    %47 = arith.truncf %46 : vector<128x128xf32> to vector<128x128xbf16>
    %c0_20 = arith.constant 0 : index
    %c0_21 = arith.constant 0 : index
    %48 = vector.load %arg9[%c0_20, %c0_21] : memref<128x128xbf16, #tpu.memory_space<vmem>>, vector<128x128xbf16>
    %cst_22 = arith.constant dense<0.000000e+00> : vector<128x128xf32>
    %49 = tpu.matmul %47, %48, %cst_22 {dimension_numbers = #tpu.dot_dimension_numbers<[1], [0], [0], [1], [0, 0, 1, 1], [], []>} : vector<128x128xbf16>, vector<128x128xbf16>, vector<128x128xf32> -> vector<128x128xf32>
    %c0_23 = arith.constant 0 : index
    %c0_24 = arith.constant 0 : index
    %50 = vector.load %arg10[%c0_23, %c0_24] : memref<1x128xf32, #tpu.memory_space<vmem>>, vector<1x128xf32>
    %51 = vector.broadcast %50 : vector<1x128xf32> to vector<128x128xf32>
    %52 = arith.addf %49, %51 : vector<128x128xf32>
    %53 = tpu.iota {dimensions = array<i32: 1>} : vector<128x128xi32>
    %c50_i32 = arith.constant 50 : i32
    %54 = vector.broadcast %c50_i32 : i32 to vector<128x128xi32>
    %55 = arith.cmpi slt, %53, %54 : vector<128x128xi32>
    %cst_25 = arith.constant -1.000000e+30 : f32
    %56 = vector.broadcast %cst_25 : f32 to vector<128x128xf32>
    %57 = arith.select %55, %52, %56 : vector<128x128xi1>, vector<128x128xf32>
    %cst_26 = arith.constant dense<0xFF800000> : vector<128xf32>
    %58 = vector.multi_reduction <maximumf>, %57, %cst_26 [1] : vector<128x128xf32> to vector<128xf32>
    %59 = vector.shape_cast %58 : vector<128xf32> to vector<128x1xf32>
    %60 = vector.broadcast %59 : vector<128x1xf32> to vector<128x128xf32>
    %61 = arith.subf %57, %60 : vector<128x128xf32>
    %62 = math.exp %61 : vector<128x128xf32>
    %cst_27 = arith.constant 0.000000e+00 : f32
    %63 = vector.broadcast %cst_27 : f32 to vector<128x128xf32>
    %64 = arith.select %55, %62, %63 : vector<128x128xi1>, vector<128x128xf32>
    %cst_28 = arith.constant dense<0.000000e+00> : vector<128xf32>
    %65 = vector.multi_reduction <add>, %64, %cst_28 [1] : vector<128x128xf32> to vector<128xf32>
    %66 = vector.shape_cast %65 : vector<128xf32> to vector<128x1xf32>
    %67 = math.log %66 : vector<128x1xf32>
    %68 = vector.broadcast %59 : vector<128x1xf32> to vector<128x128xf32>
    %69 = arith.subf %57, %68 : vector<128x128xf32>
    %70 = vector.broadcast %67 : vector<128x1xf32> to vector<128x128xf32>
    %71 = arith.subf %69, %70 : vector<128x128xf32>
    %72 = arith.truncf %71 : vector<128x128xf32> to vector<128x128xbf16>
    %c0_29 = arith.constant 0 : index
    %c0_30 = arith.constant 0 : index
    %73 = vector.load %arg11[%c0_29, %c0_30] : memref<128x128xbf16, #tpu.memory_space<vmem>>, vector<128x128xbf16>
    tpu.vector_store %arg11[%c0_29, %c0_30], %72 {strides = array<i32>} : memref<128x128xbf16, #tpu.memory_space<vmem>>, vector<128x128xbf16>,
    return
  }
  func.func @transform_0(%arg0: i32) -> (i32, i32) {
    %c0_i32 = arith.constant 0 : i32
    %c0_i32_0 = arith.constant 0 : i32
    return %arg0, %c0_i32 : i32, i32
  }
  func.func @transform_1(%arg0: i32) -> (i32, i32) {
    %c0_i32 = arith.constant 0 : i32
    %c0_i32_0 = arith.constant 0 : i32
    return %arg0, %c0_i32 : i32, i32
  }
  func.func @transform_2(%arg0: i32) -> (i32, i32) {
    %c0_i32 = arith.constant 0 : i32
    %c0_i32_0 = arith.constant 0 : i32
    %c0_i32_1 = arith.constant 0 : i32
    return %c0_i32, %c0_i32_0 : i32, i32
  }
  func.func @transform_3(%arg0: i32) -> (i32, i32) {
    %c0_i32 = arith.constant 0 : i32
    %c0_i32_0 = arith.constant 0 : i32
    %c0_i32_1 = arith.constant 0 : i32
    return %c0_i32, %c0_i32_0 : i32, i32
  }
  func.func @transform_4(%arg0: i32) -> (i32, i32) {
    %c0_i32 = arith.constant 0 : i32
    %c0_i32_0 = arith.constant 0 : i32
    %c0_i32_1 = arith.constant 0 : i32
    return %c0_i32, %c0_i32_0 : i32, i32
  }
  func.func @transform_5(%arg0: i32) -> (i32, i32) {
    %c0_i32 = arith.constant 0 : i32
    %c0_i32_0 = arith.constant 0 : i32
    %c0_i32_1 = arith.constant 0 : i32
    return %c0_i32, %c0_i32_0 : i32, i32
  }
  func.func @transform_6(%arg0: i32) -> (i32, i32) {
    %c0_i32 = arith.constant 0 : i32
    %c0_i32_0 = arith.constant 0 : i32
    %c0_i32_1 = arith.constant 0 : i32
    return %c0_i32, %c0_i32_0 : i32, i32
  }
  func.func @transform_7(%arg0: i32) -> (i32, i32) {
    %c0_i32 = arith.constant 0 : i32
    %c0_i32_0 = arith.constant 0 : i32
    %c0_i32_1 = arith.constant 0 : i32
    return %c0_i32, %c0_i32_0 : i32, i32
  }
  func.func @transform_8(%arg0: i32) -> (i32, i32) {
    %c0_i32 = arith.constant 0 : i32
    %c0_i32_0 = arith.constant 0 : i32
    %c0_i32_1 = arith.constant 0 : i32
    return %c0_i32, %c0_i32_0 : i32, i32
  }
  func.func @transform_9(%arg0: i32) -> (i32, i32) {
    %c0_i32 = arith.constant 0 : i32
    %c0_i32_0 = arith.constant 0 : i32
    %c0_i32_1 = arith.constant 0 : i32
    return %c0_i32, %c0_i32_0 : i32, i32
  }
  func.func @transform_10(%arg0: i32) -> (i32, i32) {
    %c0_i32 = arith.constant 0 : i32
    %c0_i32_0 = arith.constant 0 : i32
    return %arg0, %c0_i32 : i32, i32
  }
}

</mosaic_0001>

<bundles_post_ra>
// kernel: tpu_custom_call.1
= control target key start
LH: loop header
LB: loop body
LE: loop exit
PB: predicated region body
PF: predicated region fallthrough
CT: control target
= control target key end

     0   :  { %15 = vsyncpa [#allocation3], 0  ;;  %s3356_s0 = inlined_call_operand.vmem [shape: s32[256,1], index: 0, kind: input, shape index: {}]   ;;  %s3357_s1 = inlined_call_operand.vmem [shape: bf16[256,3], index: 1, kind: input, shape index: {}]   ;;  %s3358_s2 = inlined_call_operand.vmem [shape: f32[8,128], index: 2, kind: input, shape index: {}]   ;;  %s3359_s3 = inlined_call_operand.vmem [shape: f32[3,128], index: 3, kind: input, shape index: {}]   ;;  %s3360_s4 = inlined_call_operand.vmem [shape: bf16[128,128], index: 4, kind: input, shape index: {}]   ;;  %s3361_s5 = inlined_call_operand.vmem [shape: f32[1,128], index: 5, kind: input, shape index: {}]   ;;  %s3362_s6 = inlined_call_operand.vmem [shape: bf16[128,128], index: 6, kind: input, shape index: {}]   ;;  %s3363_s7 = inlined_call_operand.vmem [shape: f32[1,128], index: 7, kind: input, shape index: {}]   ;;  %s3364_s8 = inlined_call_operand.vmem [shape: bf16[128,128], index: 8, kind: input, shape index: {}]   ;;  %s3365_s9 = inlined_call_operand.vmem [shape: f32[1,128], index: 9, kind: input, shape index: {}]   ;;  %s3366_s10 = inlined_call_operand.hbm [shape: bf16[256,128], index: 10, kind: output, shape index: {}]  }
   0x1   :  { %17 = vsyncpa [#allocation3 + $0x1], 0  ;;  %s2754_s13 = smov 0   ;;  %s2756_s14 = smov 0  }
   0x2   :  { %s2758_s15 = smov 0   ;;  %s2760_s16 = smov 0  }
   0x3 LB: > { %s2775_s17 = sadd.s32 4294967295, %s2690_s16   ;;  %s1963_s18 = sadd.s32 4294967294, %s2690_s16   ;;  %s2690_s16 = sphi %s2760_s16, %s3372_s16   ;;  %s2686_s15 = sphi %s2758_s15, %s3371_s15   ;;  %s2682_s14 = sphi %s2756_s14, %s3370_s14   ;;  %s2678_s13 = sphi %s2754_s13, %s3369_s13  }
   0x4   : > { %s2779_s19 = sadd.s32 1, %s2690_s16   ;;  %s250_s20 = sadd.s32 1, %s2686_s15 }
   0x5   : > { %s247_s21 = ssub.s32 %s2690_s16, %s2779_s19  ;;  %p260_p0 = scmp.ne.s32.totalorder %s2686_s15, %s2682_s14 }
   0x6   : > { %p248_p1 = scmp.eq.s32.totalorder %s247_s21, 0  ;;  %p261_p2 = scmp.eq.s32.totalorder %s2775_s17, 1 }
   0x7   : > { %p266_p3 = scmp.ne.s32.totalorder %s2682_s14, %s2678_s13  ;;  %p267_p4 = scmp.eq.s32.totalorder %s1963_s18, 1 }
   0x8   : > { %s2790_s22 = scalar_select %p248_p1, %s2686_s15, %s250_s20  }
   0x9   : > { %p2792_p5 = por %p261_p2, %p260_p0  ;;  %p2796_p6 = por %p267_p4, %p266_p3 }
   0xa   : > { %p1966_p7 = scmp.ge.s32.totalorder %s2690_s16, 1  ;;  %p327_p8 = scmp.lt.s32.totalorder %s2690_s16, 3 }
   0xc   : > { %p328_p9 = pnand %p1966_p7, %p327_p8 }
   0xd   : > { %s1968_s25 = sshll.u32 (!%p328_p9), %s2775_s17, 4  ;;  %v2692_v0 = vmov (!%p328_p9), 0   ;;  %v498_v7 = vld [vmem:[%s3358_s2] sm:$0xff] (!%p328_p9)  ;;  %v2693_v27 = vmov (!%p328_p9), 1   ;;  %v2694_v32 = vmov (!%p328_p9), 2   ;;  %v2541_v52 = vld [vmem:[%s3360_s4 + $0x8] sm:$0xff] (!%p328_p9)   ;;  %v400_v56 = vlaneseq (!%p328_p9) }
   0xe   : > { %331 = sbr.rel (%p328_p9) target bundleno = 1408 (0x580), region = 60  ;;  %2404 = vset.pattern.permute.xlu1 (!%p328_p9), %v2692_v0  ;;  %2403 = vset.pattern.permute.xlu0 (!%p328_p9), %v2692_v0  ;;  %p371_p10 = scmp.lt.s32.totalorder (!%p328_p9), %s1968_s25, 31  ;;  %v2540_v47 = vld [vmem:[%s3360_s4] sm:$0xff] (!%p328_p9)   ;;  %v2542_v54 = vld [vmem:[%s3360_s4 + $0x10] sm:$0xff] (!%p328_p9)   ;;  %v2543_v55 = vld [vmem:[%s3360_s4 + $0x18] sm:$0xff] (!%p328_p9)   ;;  %vm632_vm0 = vcmask (!%p328_p9), 64512  }
   0xf   : > { %2220 = vmatprep.subr.mxu0 (!%p328_p9), %v498_v7  ;;  %2246 = vmatprep.subr.bf16.mxu1 (!%p328_p9), %v2540_v47  ;;  %v2868_v57 = vand.u32 (!%p328_p9), 127, %v400_v56  ;;  %v2695_v60 = vmov (!%p328_p9), 0.0  }
  0x10   : > { %2221 = vmatpush3.msra.mxu0 (!%p328_p9), %v498_v7  ;;  %2247 = vmatpush3.bf16.msra.mxu1 (!%p328_p9), %v2540_v47 }
  0x11   : > { %2248 = vmatprep.subr.bf16.mxu1 (!%p328_p9), %v2541_v52 }
  0x14   : > { %2249 = vmatpush3.bf16.msra.mxu1 (!%p328_p9), %v2541_v52 }
  0x15   : > { %s3374_s25 = smov (!%p371_p10, %s1968_s25), 31  ;;  %2250 = vmatprep.subr.bf16.mxu1 %v2542_v54 }
  0x16   : > { %s1969_s26 = sshll.u32 %s3374_s25, 3  ;;  %s1971_s30 = sshll.u32 %s3374_s25, 2 }
  0x17   : > { %s2811_s29 = scalar_lea.vmem %s3356_s0, %s1969_s26  ;;  %s2832_s21 = scalar_lea.vmem %s3357_s1, %s1971_s30 }
  0x18   : > { %v386_v1 = vld [vmem:[%s2811_s29 + $0x10] sm:$0xff]  ;;  %v384_v2 = vld [vmem:[%s2811_s29] sm:$0xff]  ;;  %v387_v3 = vld [vmem:[%s2811_s29 + $0x18] sm:$0xff]  ;;  %2251 = vmatpush3.bf16.msra.mxu1 %v2542_v54  ;;  %s367_s26 = sand.u32 1, %s2682_s14  }
  0x19   : > { %409 = vperm.xlu1 %2404, %v386_v1   ;;  %403 = vperm.xlu0 %2403, %v384_v2   ;;  %v385_v4 = vld [vmem:[%s2811_s29 + $0x8] sm:$0xff]  ;;  %v388_v6 = vld [vmem:[%s2811_s29 + $0x20] sm:$0xff]  ;;  %v391_v8 = vld [vmem:[%s2811_s29 + $0x38] sm:$0xff]  ;;  %s1967_s27 = sshll.u32 %s367_s26, 6 }
  0x1a   : > { %v389_v5 = vld [vmem:[%s2811_s29 + $0x28] sm:$0xff]  ;;  %v390_v9 = vld [vmem:[%s2811_s29 + $0x30] sm:$0xff]  ;;  %v392_v11 = vld [vmem:[%s2811_s29 + $0x40] sm:$0xff]  ;;  %2252 = vmatprep.subr.bf16.mxu1 %v2543_v55  ;;  %s3280_s28 = scalar_lea.vmem [#allocation2], %s1967_s27 }
  0x1b   : > { %v393_v10 = vld [vmem:[%s2811_s29 + $0x48] sm:$0xff]  ;;  %v395_v12 = vld [vmem:[%s2811_s29 + $0x58] sm:$0xff]  ;;  %v394_v13 = vld [vmem:[%s2811_s29 + $0x50] sm:$0xff]  ;;  %s1889_s30 = sshll.u32 %s3280_s28, 4  ;;  %s3310_s30 = int_to_ptr.vmem [resolvable:$true] %s1889_s30 }
  0x1c   : > { %v397_v14 = vld [vmem:[%s2811_s29 + $0x68] sm:$0xff]  ;;  %v396_v15 = vld [vmem:[%s2811_s29 + $0x60] sm:$0xff]  ;;  %v399_v22 = vld [vmem:[%s2811_s29 + $0x78] sm:$0xff]  ;;  %2253 = vmatpush3.bf16.msra.mxu1 %v2543_v55  ;;  %s2628_s20 = scalar_lea.vmem %s3310_s30, 1024 }
  0x1d   : > { %412 = vperm.xlu1 %2404, %v387_v3   ;;  %406 = vperm.xlu0 %2403, %v385_v4   ;;  %v2141_v16 = vld [vmem:[%s2832_s21 + $0x8] sm:$0xff]   ;;  %v2070_v17 = vld [vmem:[%s2832_s21] sm:$0xff]   ;;  %v398_v23 = vld [vmem:[%s2811_s29 + $0x70] sm:$0xff]  ;;  %s2068_s29 = sshll.u32 %s2775_s17, 10  ;;  %s3315_s17 = scalar_lea.sflag [#allocation3], %s367_s26 }
  0x1e   : > { %v2075_v18 = vunpack.c.l.bf16 %v2141_v16  ;;  %v2076_v19 = vunpack.c.h.bf16 %v2141_v16  ;;  %v2071_v20 = vunpack.c.l.bf16 %v2070_v17  ;;  %v2072_v21 = vunpack.c.h.bf16 %v2070_v17  ;;  %v2142_v26 = vld [vmem:[%s2832_s21 + $0x10] sm:$0xff]   ;;  %v2143_v31 = vld [vmem:[%s2832_s21 + $0x18] sm:$0xff]   ;;  %v2145_v35 = vld [vmem:[%s2832_s21 + $0x28] sm:$0xff]   ;;  %s3308_s18 = scalar_lea.hbm %s3366_s10, %s2068_s29  ;;  %p2629_p11 = scmp.ne.s32.totalorder %s3310_s30, %s2628_s20 }
  0x1f   : > { %v2079_v28 = vunpack.c.l.bf16 %v2142_v26  ;;  %v2080_v29 = vunpack.c.h.bf16 %v2142_v26  ;;  %v2083_v33 = vunpack.c.l.bf16 %v2143_v31  ;;  %v2084_v34 = vunpack.c.h.bf16 %v2143_v31  ;;  %v2144_v39 = vld [vmem:[%s2832_s21 + $0x20] sm:$0xff]   ;;  %v2146_v43 = vld [vmem:[%s2832_s21 + $0x30] sm:$0xff]   ;;  %v2147_v48 = vld [vmem:[%s2832_s21 + $0x38] sm:$0xff]   ;;  %s2696_s21 = smov [#allocation2]  }
  0x20   : > { %v2410_v24 = vpack.i.bf16 %v2076_v19, %v2075_v18  ;;  %v2405_v25 = vpack.i.bf16 %v2072_v21, %v2071_v20  ;;  %v2091_v37 = vunpack.c.l.bf16 %v2145_v35  ;;  %v2092_v38 = vunpack.c.h.bf16 %v2145_v35  ;;  %v2548_v31 = vld [vmem:[%s3362_s6] sm:$0xff]   ;;  %p2630_p12 = pnand %p2629_p11, %p2792_p5  ;;  %s2632_s25 = sshll.u32 %s2696_s21, 4  ;;  %s2633_s25 = int_to_ptr.vmem [resolvable:$false] %s2632_s25 }
  0x21   : > { %418 = vperm.xlu1 %2404, %v389_v5   ;;  %415 = vperm.xlu0 %2403, %v388_v6   ;;  %v2444_v30 = vpack.i.bf16 %v2080_v29, %v2079_v28  ;;  %v2439_v36 = vpack.i.bf16 %v2084_v34, %v2083_v33  ;;  %v2087_v41 = vunpack.c.l.bf16 %v2144_v39  ;;  %v2088_v42 = vunpack.c.h.bf16 %v2144_v39  ;;  %v2545_v28 = vld [vmem:[%s3360_s4 + $0x28] sm:$0xff]   ;;  %v2546_v29 = vld [vmem:[%s3360_s4 + $0x30] sm:$0xff]   ;;  %v2551_v34 = vld [vmem:[%s3362_s6 + $0x18] sm:$0xff]   ;;  %s2634_s27 = scalar_lea.vmem %s2633_s25, 2048  ;;  %p2635_p0 = scmp.lt.s32.totalorder %s3310_s30, %s2633_s25 }
  0x22   : > { %v2495_v40 = vpack.i.bf16 %v2092_v38, %v2091_v37  ;;  %v2095_v45 = vunpack.c.l.bf16 %v2146_v43  ;;  %v2096_v46 = vunpack.c.h.bf16 %v2146_v43  ;;  %v2099_v50 = vunpack.c.l.bf16 %v2147_v48  ;;  %2278 = vmatprep.subr.bf16.mxu0 %v2548_v31  ;;  %v2550_v33 = vld [vmem:[%s3362_s6 + $0x10] sm:$0xff]   ;;  %v2552_v35 = vld [vmem:[%s3362_s6 + $0x20] sm:$0xff]   ;;  %p2631_p13 = pneg %p2630_p12  ;;  %p2636_p1 = scmp.lt.s32.totalorder %s2634_s27, %s2628_s20 }
  0x23   : > { %v2501_v44 = vpack.i.bf16 %v2088_v42, %v2087_v41  ;;  %v2100_v51 = vunpack.c.h.bf16 %v2147_v48 }
  0x24   : > { %v2517_v49 = vpack.i.bf16 %v2096_v46, %v2095_v45  ;;  %v613_v46 = vshrl.u32 %v400_v56, 7  ;;  %p2637_p2 = por %p2636_p1, %p2635_p0 }
  0x25   : > { %424 = vperm.xlu1 %2404, %v391_v8   ;;  %421 = vperm.xlu0 %2403, %v390_v9   ;;  %v2535_v53 = vpack.i.bf16 %v2100_v51, %v2099_v50 }
  0x26   : > { %v614_v48 = vsub.s32 0, %v613_v46  ;;  %v892_v52 = vsub.s32 1, %v613_v46  ;;  %v992_v54 = vsub.s32 2, %v613_v46  ;;  %p2638_p3 = pnand %p2637_p2, %p2631_p13 }
  0x29   : > { %430 = vperm.xlu1 %2404, %v393_v10   ;;  %427 = vperm.xlu0 %2403, %v392_v11  }
  0x2d   : > { %436 = vperm.xlu1 %2404, %v395_v12   ;;  %433 = vperm.xlu0 %2403, %v394_v13  }
  0x31   : > { %442 = vperm.xlu1 %2404, %v397_v14   ;;  %439 = vperm.xlu0 %2403, %v396_v15  }
  0x35   : > { %448 = vperm.xlu1 %2404, %v399_v22   ;;  %445 = vperm.xlu0 %2403, %v398_v23  }
  0x39   : > { %2411 = vperm.xlu1 %2404, %v2410_v24   ;;  %2406 = vperm.xlu0 %2403, %v2405_v25  }
  0x3d   : > { %2421 = vset.pattern.permute.xlu1 %v2693_v27  ;;  %2415 = vset.pattern.permute.xlu0 %v2693_v27 }
  0x3e   : > { %2423 = vperm.xlu1 %2421, %v2410_v24   ;;  %2417 = vperm.xlu0 %2415, %v2405_v25  }
  0x42   : > { %2427 = vset.pattern.permute.xlu1 %v2694_v32  ;;  %2445 = vperm.xlu0 %2415, %v2444_v30  }
  0x43   : > { %2429 = vperm.xlu1 %2427, %v2405_v25  }
  0x46   : > { %2449 = vset.pattern.permute.xlu0 %v2694_v32 }
  0x47   : > { %2433 = vset.pattern.permute.xlu1 %v2692_v0  ;;  %2451 = vperm.xlu0 %2449, %v2410_v24  }
  0x48   : > { %2435 = vperm.xlu1 %2433, %v2444_v30  }
  0x4b   : > { %2468 = vperm.xlu0 %2449, %v2439_v36  }
  0x4c   : > { %2440 = vperm.xlu1 %2433, %v2439_v36  }
  0x4f   : > { %2496 = vperm.xlu0 %2449, %v2495_v40  }
  0x50   : > { %2455 = vset.pattern.permute.xlu1 %v2693_v27 }
  0x51   : > { %2457 = vperm.xlu1 %2455, %v2439_v36   ;;  %v2553_v36 = vld [vmem:[%s3362_s6 + $0x28] sm:$0xff]  }
  0x53   : > { %2500 = vset.pattern.permute.xlu0 %v2693_v27 }
  0x54   : > { %2502 = vperm.xlu0 %2500, %v2501_v44  }
  0x55   : > { %2461 = vset.pattern.permute.xlu1 %v2694_v32 }
  0x56   : > { %2463 = vperm.xlu1 %2461, %v2444_v30   ;;  %v2547_v30 = vld [vmem:[%s3360_s4 + $0x38] sm:$0xff]  }
  0x58   : > { %2518 = vperm.xlu0 %2500, %v2517_v49  }
  0x5a   : > { %2472 = vset.pattern.permute.xlu1 %v2692_v0 }
  0x5b   : > { %2474 = vperm.xlu1 %2472, %v2501_v44  }
  0x5c   : > { %2534 = vset.pattern.permute.xlu0 %v2694_v32 }
  0x5d   : > { %2536 = vperm.xlu0 %2534, %v2535_v53  }
  0x5f   : > { %2479 = vperm.xlu1 %2472, %v2495_v40  }
  0x63   : > { %2483 = vset.pattern.permute.xlu1 %v2693_v27 }
  0x64   : > { %2485 = vperm.xlu1 %2483, %v2495_v40  }
  0x68   : > { %2489 = vset.pattern.permute.xlu1 %v2694_v32 }
  0x69   : > { %2491 = vperm.xlu1 %2489, %v2501_v44  }
  0x6d   : > { %2506 = vset.pattern.permute.xlu1 %v2692_v0 }
  0x6e   : > { %2508 = vperm.xlu1 %2506, %v2517_v49  }
  0x72   : > { %2513 = vperm.xlu1 %2506, %v2535_v53  }
  0x76   : > { %2522 = vset.pattern.permute.xlu1 %v2693_v27  ;;  %v2544_v27 = vld [vmem:[%s3360_s4 + $0x20] sm:$0xff]  }
  0x77   : > { %2524 = vperm.xlu1 %2522, %v2535_v53   ;;  %2254 = vmatprep.subr.bf16.mxu1 %v2544_v27 }
  0x78   : > { %2255 = vmatpush3.bf16.msra.mxu1 %v2544_v27 }
  0x79   : > { %2256 = vmatprep.subr.bf16.mxu1 %v2545_v28 }
  0x7b   : > { %2528 = vset.pattern.permute.xlu1 %v2694_v32  ;;  %v2549_v32 = vld [vmem:[%s3362_s6 + $0x8] sm:$0xff]  }
  0x7c   : > { %2530 = vperm.xlu1 %2528, %v2517_v49   ;;  %2257 = vmatpush3.bf16.msra.mxu1 %v2545_v28  ;;  %v531_v49 = vld [vmem:[%s3359_s3] sm:$0x7] }
  0x7d   : > { %2258 = vmatprep.subr.bf16.mxu1 %v2546_v29  ;;  %v2944_v55 = vrot.slane %v531_v49, %v614_v48  ;;  %v2948_v56 = vrot.slane %v531_v49, %v892_v52 }
  0x80   : > { %2259 = vmatpush3.bf16.msra.mxu1 %v2546_v29 }
  0x81   : > { %2260 = vmatprep.subr.bf16.mxu1 %v2547_v30 }
  0x84   : > { %2261 = vmatpush3.bf16.msra.mxu1 %v2547_v30 }
  0x98   : > { %v410_v58 = vpop.permute.xlu1 %409  ;;  %v404_v59 = vpop.permute.xlu0 %403 }
  0x99   : > { %vm450_vm1 = vcmp.eq.s32.totalorder %v2868_v57, %v404_v59  ;;  %vm452_vm2 = vcmp.eq.s32.totalorder %v2868_v57, %v410_v58 }
  0x9a   : > { %v1972_v61 = vsel %vm450_vm1, 1.0, %v2695_v60  ;;  %v1974_v0 = vsel %vm452_vm2, 1.0, %v2695_v60 }
  0x9b   : > { %2222 = vmatprep.mubr.msk.f32.mxu0 %vm632_vm0, %v1972_v61 }
  0x9c   : > { %v413_v62 = vpop.permute.xlu1 %412  ;;  %v407_v63 = vpop.permute.xlu0 %406 }
  0x9d   : > { %vm451_vm3 = vcmp.eq.s32.totalorder %v2868_v57, %v407_v63  ;;  %vm453_vm4 = vcmp.eq.s32.totalorder %v2868_v57, %v413_v62 }
  0x9e   : > { %v1973_v1 = vsel %vm451_vm3, 1.0, %v2695_v60  ;;  %v1975_v4 = vsel %vm453_vm4, 1.0, %v2695_v60 }
  0x9f   : > { %2223 = vmatmul.mubr.msk.f32.vlgmr.msra.gmra.mrb[0].mxu0 %vm632_vm0, %v1973_v1 }
  0xa0   : > { %v419_v2 = vpop.permute.xlu1 %418  ;;  %2225 = vmatprep.mubr.msk.f32.mxu0 %vm632_vm0, %v1974_v0  ;;  %v416_v3 = vpop.permute.xlu0 %415  ;;  %2279 = vmatpush3.bf16.msra.mxu0 %v2548_v31  ;;  %v2950_v0 = vrot.slane %v531_v49, %v992_v54 }
  0xa1   : > { %vm454_vm5 = vcmp.eq.s32.totalorder %v2868_v57, %v416_v3  ;;  %vm455_vm6 = vcmp.eq.s32.totalorder %v2868_v57, %v419_v2  ;;  %2280 = vmatprep.subr.bf16.mxu0 %v2549_v32 }
  0xa2   : > { %v1976_v5 = vsel %vm454_vm5, 1.0, %v2695_v60  ;;  %v1977_v8 = vsel %vm455_vm6, 1.0, %v2695_v60 }
  0xa3   : > { %2226 = vmatmul.mubr.msk.f32.gmra.mrb[2].mxu0 %vm632_vm0, %v1975_v4 }
  0xa4   : > { %v425_v6 = vpop.permute.xlu1 %424  ;;  %2228 = vmatprep.mubr.msk.f32.mxu0 %vm632_vm0, %v1976_v5  ;;  %v422_v7 = vpop.permute.xlu0 %421  ;;  %2281 = vmatpush3.bf16.msra.mxu0 %v2549_v32 }
  0xa5   : > { %vm456_vm7 = vcmp.eq.s32.totalorder %v2868_v57, %v422_v7  ;;  %vm457_vm8 = vcmp.eq.s32.totalorder %v2868_v57, %v425_v6  ;;  %2282 = vmatprep.subr.bf16.mxu0 %v2550_v33 }
  0xa6   : > { %v1978_v9 = vsel %vm456_vm7, 1.0, %v2695_v60  ;;  %v1979_v12 = vsel %vm457_vm8, 1.0, %v2695_v60 }
  0xa7   : > { %2229 = vmatmul.mubr.msk.f32.gmra.mrb[4].mxu0 %vm632_vm0, %v1977_v8 }
  0xa8   : > { %v431_v10 = vpop.permute.xlu1 %430  ;;  %2231 = vmatprep.mubr.msk.f32.mxu0 %vm632_vm0, %v1978_v9  ;;  %v428_v11 = vpop.permute.xlu0 %427  ;;  %2283 = vmatpush3.bf16.msra.mxu0 %v2550_v33 }
  0xa9   : > { %vm458_vm9 = vcmp.eq.s32.totalorder %v2868_v57, %v428_v11  ;;  %vm459_vm10 = vcmp.eq.s32.totalorder %v2868_v57, %v431_v10  ;;  %2284 = vmatprep.subr.bf16.mxu0 %v2551_v34 }
  0xaa   : > { %v1980_v13 = vsel %vm458_vm9, 1.0, %v2695_v60  ;;  %v1981_v16 = vsel %vm459_vm10, 1.0, %v2695_v60 }
  0xab   : > { %2232 = vmatmul.mubr.msk.f32.gmra.mrb[6].mxu0 %vm632_vm0, %v1979_v12 }
  0xac   : > { %v437_v14 = vpop.permute.xlu1 %436  ;;  %2234 = vmatprep.mubr.msk.f32.mxu0 %vm632_vm0, %v1980_v13  ;;  %v434_v15 = vpop.permute.xlu0 %433  ;;  %2285 = vmatpush3.bf16.msra.mxu0 %v2551_v34 }
  0xad   : > { %vm460_vm11 = vcmp.eq.s32.totalorder %v2868_v57, %v434_v15  ;;  %vm461_vm12 = vcmp.eq.s32.totalorder %v2868_v57, %v437_v14  ;;  %2286 = vmatprep.subr.bf16.mxu0 %v2552_v35 }
  0xae   : > { %v1982_v17 = vsel %vm460_vm11, 1.0, %v2695_v60  ;;  %v1983_v20 = vsel %vm461_vm12, 1.0, %v2695_v60 }
  0xaf   : > { %2235 = vmatmul.mubr.msk.f32.gmra.mrb[8].mxu0 %vm632_vm0, %v1981_v16 }
  0xb0   : > { %v443_v18 = vpop.permute.xlu1 %442  ;;  %2237 = vmatprep.mubr.msk.f32.mxu0 %vm632_vm0, %v1982_v17  ;;  %v440_v19 = vpop.permute.xlu0 %439  ;;  %2287 = vmatpush3.bf16.msra.mxu0 %v2552_v35 }
  0xb1   : > { %vm462_vm13 = vcmp.eq.s32.totalorder %v2868_v57, %v440_v19  ;;  %vm463_vm14 = vcmp.eq.s32.totalorder %v2868_v57, %v443_v18  ;;  %2288 = vmatprep.subr.bf16.mxu0 %v2553_v36 }
  0xb2   : > { %v1984_v21 = vsel %vm462_vm13, 1.0, %v2695_v60  ;;  %v1985_v24 = vsel %vm463_vm14, 1.0, %v2695_v60 }
  0xb3   : > { %2238 = vmatmul.mubr.msk.f32.gmra.mrb[10].mxu0 %vm632_vm0, %v1983_v20 }
  0xb4   : > { %v449_v22 = vpop.permute.xlu1 %448  ;;  %2240 = vmatprep.mubr.msk.f32.mxu0 %vm632_vm0, %v1984_v21  ;;  %v446_v23 = vpop.permute.xlu0 %445  ;;  %2289 = vmatpush3.bf16.msra.mxu0 %v2553_v36 }
  0xb5   : > { %vm464_vm15 = vcmp.eq.s32.totalorder %v2868_v57, %v446_v23  ;;  %vm465_vm1 = vcmp.eq.s32.totalorder %v2868_v57, %v449_v22 }
  0xb6   : > { %v1986_v25 = vsel %vm464_vm15, 1.0, %v2695_v60  ;;  %v1987_v26 = vsel %vm465_vm1, 1.0, %v2695_v60 }
  0xb7   : > { %2241 = vmatmul.mubr.msk.f32.gmra.mrb[12].mxu0 %vm632_vm0, %v1985_v24 }
  0xb8   : > { %2243 = vmatprep.mubr.msk.f32.mxu0 %vm632_vm0, %v1986_v25  ;;  %v2412_v37 = vpop.permute.xlu1 %2411  ;;  %v2407_v44 = vpop.permute.xlu0 %2406 }
  0xb9   : > { %v2409_v53 = vunpack.i.h.bf16 %v2407_v44  ;;  %v2408_v58 = vunpack.i.l.bf16 %v2407_v44  ;;  %v2414_v60 = vunpack.i.h.bf16 %v2412_v37  ;;  %v2413_v61 = vunpack.i.l.bf16 %v2412_v37 }
  0xbb   : > { %2244 = vmatmul.mubr.msk.f32.gmra.mrb[14].mxu0 %vm632_vm0, %v1987_v26  ;;  %v617_v2 = vmul.f32 %v2409_v53, %v2944_v55  ;;  %v616_v6 = vmul.f32 %v2408_v58, %v2944_v55  ;;  %v619_v10 = vmul.f32 %v2414_v60, %v2944_v55  ;;  %v618_v14 = vmul.f32 %v2413_v61, %v2944_v55 }
  0xbc   : > { %vm1602_vm0 = vcmp.lt.s32.totalorder %v2868_v57, 50 }
  0xbd   : > { %v2424_v38 = vpop.permute.xlu1 %2423  ;;  %v2418_v47 = vpop.permute.xlu0 %2417 }
  0xbe   : > { %v2426_v62 = vunpack.i.h.bf16 %v2424_v38  ;;  %v2425_v63 = vunpack.i.l.bf16 %v2424_v38  ;;  %v2420_v4 = vunpack.i.h.bf16 %v2418_v47  ;;  %v2419_v5 = vunpack.i.l.bf16 %v2418_v47 }
  0xc0   : > { %v897_v11 = vmul.f32 %v2426_v62, %v2948_v56  ;;  %v896_v16 = vmul.f32 %v2425_v63, %v2948_v56  ;;  %v895_v22 = vmul.f32 %v2420_v4, %v2948_v56  ;;  %v894_v23 = vmul.f32 %v2419_v5, %v2948_v56 }
  0xc1   : > { %v2446_v51 = vpop.permute.xlu0 %2445 }
  0xc2   : > { %v2430_v39 = vpop.permute.xlu1 %2429  ;;  %v2448_v8 = vunpack.i.h.bf16 %v2446_v51  ;;  %v2447_v9 = vunpack.i.l.bf16 %v2446_v51 }
  0xc3   : > { %v2432_v3 = vunpack.i.h.bf16 %v2430_v39  ;;  %v2431_v7 = vunpack.i.l.bf16 %v2430_v39 }
  0xc4   : > { %v2966_v26 = vmul.f32 %v2448_v8, %v2948_v56  ;;  %v2969_v27 = vmul.f32 %v2447_v9, %v2948_v56 }
  0xc5   : > { %v995_v20 = vmul.f32 %v2432_v3, %v2950_v0  ;;  %v994_v24 = vmul.f32 %v2431_v7, %v2950_v0 }
  0xc6   : > { %v2452_v1 = vpop.permute.xlu0 %2451 }
  0xc7   : > { %v2932_v40 = vpop.permute.xlu1 %2435  ;;  %v2454_v12 = vunpack.i.h.bf16 %v2452_v1  ;;  %v2453_v13 = vunpack.i.l.bf16 %v2452_v1 }
  0xc8   : > { %v2438_v25 = vunpack.i.h.bf16 %v2932_v40  ;;  %v2437_v29 = vunpack.i.l.bf16 %v2932_v40 }
  0xc9   : > { %v997_v31 = vmul.f32 %v2454_v12, %v2950_v0  ;;  %v996_v32 = vmul.f32 %v2453_v13, %v2950_v0 }
  0xca   : > { %v2469_v28 = vpop.permute.xlu0 %2468  ;;  %v621_v48 = vmul.f32 %v2438_v25, %v2944_v55  ;;  %v620_v52 = vmul.f32 %v2437_v29, %v2944_v55 }
  0xcb   : > { %v2934_v41 = vpop.permute.xlu1 %2440  ;;  %v2471_v51 = vunpack.i.h.bf16 %v2469_v28  ;;  %v2470_v58 = vunpack.i.l.bf16 %v2469_v28 }
  0xcc   : > { %v2443_v30 = vunpack.i.h.bf16 %v2934_v41  ;;  %v2442_v33 = vunpack.i.l.bf16 %v2934_v41 }
  0xcd   : > { %v1001_v8 = vmul.f32 %v2471_v51, %v2950_v0 }
  0xce   : > { %v623_v53 = vmul.f32 %v2443_v30, %v2944_v55  ;;  %v2497_v61 = vpop.permute.xlu0 %2496  ;;  %v622_v62 = vmul.f32 %v2442_v33, %v2944_v55 }
  0xd0   : > { %v2458_v42 = vpop.permute.xlu1 %2457 }
  0xd1   : > { %v2460_v17 = vunpack.i.h.bf16 %v2458_v42  ;;  %v2459_v18 = vunpack.i.l.bf16 %v2458_v42 }
  0xd3   : > { %v2977_v34 = vmul.f32 %v2460_v17, %v2948_v56  ;;  %v2980_v35 = vmul.f32 %v2459_v18, %v2948_v56  ;;  %v1000_v17 = vmul.f32 %v2470_v58, %v2950_v0 }
  0xd5   : > { %v2464_v43 = vpop.permute.xlu1 %2463 }
  0xd6   : > { %v2466_v19 = vunpack.i.h.bf16 %v2464_v43  ;;  %v2465_v21 = vunpack.i.l.bf16 %v2464_v43 }
  0xd8   : > { %v2983_v36 = vmul.f32 %v2466_v19, %v2950_v0  ;;  %v2986_v38 = vmul.f32 %v2465_v21, %v2950_v0  ;;  %v2503_v21 = vpop.permute.xlu0 %2502 }
  0xda   : > { %v2936_v45 = vpop.permute.xlu1 %2474 }
  0xdb   : > { %v2477_v39 = vunpack.i.h.bf16 %v2936_v45  ;;  %v2476_v40 = vunpack.i.l.bf16 %v2936_v45 }
  0xdd   : > { %v3001_v3 = vmul.f32 %v2476_v40, %v2944_v55  ;;  %v2505_v40 = vunpack.i.h.bf16 %v2503_v21 }
  0xde   : > { %v2942_v50 = vpop.permute.xlu1 %2479 }
  0xdf   : > { %v2482_v44 = vunpack.i.h.bf16 %v2942_v50  ;;  %v2481_v46 = vunpack.i.l.bf16 %v2942_v50 }
  0xe1   : > { %v3007_v7 = vmul.f32 %v2481_v46, %v2944_v55 }
  0xe3   : > { %v2946_v59 = vpop.permute.xlu1 %2485 }
  0xe4   : > { %v2488_v45 = vunpack.i.h.bf16 %v2946_v59  ;;  %v2487_v9 = vunpack.i.l.bf16 %v2946_v59 }
  0xe6   : > { %v3015_v18 = vmul.f32 %v2488_v45, %v2948_v56 }
  0xe8   : > { %v2957_v15 = vpop.permute.xlu1 %2491 }
  0xe9   : > { %v2494_v59 = vunpack.i.h.bf16 %v2957_v15 }
  0xed   : > { %v2990_v41 = vpop.permute.xlu1 %2508 }
  0xf1   : > { %v3011_v13 = vpop.permute.xlu1 %2513 }
 0x172   : > { %v2224_v37 = vpop.f32.mrb[0].mxu0 }
 0x173   : > { %v753_v42 = vadd.f32 %v2224_v37, %v617_v2  ;;  %v747_v43 = vpop.f32.mrb[1].mxu0  ;;  %v625_v2 = vmul.f32 %v2477_v39, %v2944_v55  ;;  %v2493_v37 = vunpack.i.l.bf16 %v2957_v15 }
 0x174   : > { %v748_v47 = vadd.f32 %v747_v43, %v616_v6  ;;  %v3004_v6 = vmul.f32 %v2482_v44, %v2944_v55 }
 0x175   : > { %v911_v49 = vadd.f32 %v895_v22, %v753_v42  ;;  %v904_v42 = vmul.f32 %v2487_v9, %v2948_v56 }
 0x176   : > { %v910_v54 = vadd.f32 %v894_v23, %v748_v47  ;;  %v2227_v60 = vpop.f32.mrb[2].mxu0  ;;  %v2499_v23 = vunpack.i.h.bf16 %v2497_v61 }
 0x177   : > { %v763_v63 = vadd.f32 %v2227_v60, %v619_v10  ;;  %v757_v1 = vpop.f32.mrb[3].mxu0  ;;  %v1011_v50 = vadd.f32 %v995_v20, %v911_v49  ;;  %v1003_v49 = vmul.f32 %v2494_v59, %v2950_v0  ;;  %v903_v60 = vmul.f32 %v2505_v40, %v2948_v56 }
 0x178   : > { %v758_v4 = vadd.f32 %v757_v1, %v618_v14  ;;  %v1010_v5 = vadd.f32 %v994_v24, %v910_v54  ;;  %v2498_v24 = vunpack.i.l.bf16 %v2497_v61  ;;  %v1005_v46 = vmul.f32 %v2499_v23, %v2950_v0  ;;  %v2519_v61 = vpop.permute.xlu0 %2518 }
 0x179   : > { %v913_v10 = vadd.f32 %v897_v11, %v763_v63  ;;  %v1027_v12 = vmax.f32 %v1011_v50, 0.0  ;;  %v2511_v1 = vunpack.i.h.bf16 %v2990_v41 }
 0x17a   : > { %v912_v14 = vadd.f32 %v896_v16, %v758_v4  ;;  %v2230_v19 = vpop.f32.mrb[4].mxu0  ;;  %v1026_v20 = vmax.f32 %v1010_v5, 0.0  ;;  %v3020_v16 = vpop.permute.xlu1 %2524  ;;  %v3026_v47 = vmul.f32 %v2498_v24, %v2950_v0  ;;  %v2516_v4 = vunpack.i.h.bf16 %v3011_v13 }
 0x17b   : > { %v1013_v22 = vadd.f32 %v997_v31, %v913_v10  ;;  %v773_v25 = vadd.f32 %v2230_v19, %v621_v48  ;;  %v767_v28 = vpop.f32.mrb[5].mxu0  ;;  %v2527_v40 = vunpack.i.h.bf16 %v3020_v16 }
 0x17c   : > { %v1012_v29 = vadd.f32 %v996_v32, %v912_v14  ;;  %v768_v11 = vadd.f32 %v767_v28, %v620_v52  ;;  %v1042_v30 = vpack.c.bf16 %v1027_v12, %v1026_v20  ;;  %v2504_v32 = vunpack.i.l.bf16 %v2503_v21 }
 0x17d   : > { %v1029_v33 = vmax.f32 %v1013_v22, 0.0  ;;  %v915_v39 = vadd.f32 %v2966_v26, %v773_v25  ;;  %v2521_v14 = vunpack.i.h.bf16 %v2519_v61  ;;  %v2520_v22 = vunpack.i.l.bf16 %v2519_v61 }
 0x17e   : > { %v1028_v31 = vmax.f32 %v1012_v29, 0.0  ;;  %v914_v43 = vadd.f32 %v2969_v27, %v768_v11  ;;  %v2233_v44 = vpop.f32.mrb[6].mxu0  ;;  %2262 = vmatprep.mubr.bf16.mxu1 %v1042_v30  ;;  %v1002_v27 = vmul.f32 %v2493_v37, %v2950_v0 }
 0x17f   : > { %v1015_v15 = vadd.f32 %v2983_v36, %v915_v39  ;;  %v783_v48 = vadd.f32 %v2233_v44, %v623_v53  ;;  %v777_v26 = vpop.f32.mrb[7].mxu0  ;;  %v902_v53 = vmul.f32 %v2504_v32, %v2948_v56  ;;  %v907_v11 = vmul.f32 %v2521_v14, %v2948_v56 }
 0x180   : > { %v1014_v51 = vadd.f32 %v2986_v38, %v914_v43  ;;  %v778_v52 = vadd.f32 %v777_v26, %v622_v62  ;;  %v1043_v54 = vpack.c.bf16 %v1029_v33, %v1028_v31  ;;  %v2510_v38 = vunpack.i.l.bf16 %v2990_v41  ;;  %v2537_v33 = vpop.permute.xlu0 %2536 }
 0x181   : > { %v1031_v58 = vmax.f32 %v1015_v15, 0.0  ;;  %v917_v45 = vadd.f32 %v2977_v34, %v783_v48  ;;  %v2531_v34 = vpop.permute.xlu1 %2530  ;;  %v906_v39 = vmul.f32 %v2520_v22, %v2948_v56  ;;  %v2556_v22 = vld [vmem:[%s3364_s8] sm:$0xff]  }
 0x182   : > { %v1030_v63 = vmax.f32 %v1014_v51, 0.0  ;;  %v916_v36 = vadd.f32 %v2980_v35, %v778_v52  ;;  %v2236_v50 = vpop.f32.mrb[8].mxu0  ;;  %2263 = vmatmul.mubr.bf16.vlgmr.msra.gmra.mrb[0].mxu1 %v1043_v54  ;;  %v2515_v35 = vunpack.i.l.bf16 %v3011_v13  ;;  %v2533_v41 = vunpack.i.h.bf16 %v2531_v34  ;;  %2342 = vmatprep.subr.bf16.mxu1 %v2556_v22 }
 0x183   : > { %v1017_v62 = vadd.f32 %v1001_v8, %v917_v45  ;;  %v793_v5 = vadd.f32 %v2236_v50, %v625_v2  ;;  %v787_v9 = vpop.f32.mrb[9].mxu0  ;;  %v629_v8 = vmul.f32 %v2511_v1, %v2944_v55  ;;  %v2532_v29 = vunpack.i.l.bf16 %v2531_v34  ;;  %2350 = vmatpush3.bf16.msra.mxu1 %v2556_v22 }
 0x184   : > { %v1016_v10 = vadd.f32 %v1000_v17, %v916_v36  ;;  %v788_v12 = vadd.f32 %v787_v9, %v3001_v3  ;;  %v1044_v19 = vpack.c.bf16 %v1031_v58, %v1030_v63  ;;  %v628_v3 = vmul.f32 %v2510_v38, %v2944_v55 }
 0x185   : > { %v1033_v20 = vmax.f32 %v1017_v62, 0.0  ;;  %v919_v21 = vadd.f32 %v903_v60, %v793_v5  ;;  %v1007_v32 = vmul.f32 %v2533_v41, %v2950_v0  ;;  %v2539_v51 = vunpack.i.h.bf16 %v2537_v33  ;;  %v3083_v41 = vld [vmem:[%s3364_s8 + $0x20] sm:$0xff]  }
 0x186   : > { %v1032_v23 = vmax.f32 %v1016_v10, 0.0  ;;  %v918_v24 = vadd.f32 %v902_v53, %v788_v12  ;;  %v2239_v25 = vpop.f32.mrb[10].mxu0  ;;  %2266 = vmatprep.mubr.bf16.mxu1 %v1044_v19 }
 0x187   : > { %v1019_v2 = vadd.f32 %v1003_v49, %v919_v21  ;;  %v803_v28 = vadd.f32 %v2239_v25, %v3004_v6  ;;  %v797_v17 = vpop.f32.mrb[11].mxu0  ;;  %v2526_v6 = vunpack.i.l.bf16 %v3020_v16  ;;  %v631_v16 = vmul.f32 %v2516_v4, %v2944_v55  ;;  %v2554_v21 = vld [vmem:[%s3362_s6 + $0x30] sm:$0xff]   ;;  %v3077_v25 = vld [vmem:[%s3364_s8 + $0x18] sm:$0xff]  }
 0x188   : > { %v1018_v59 = vadd.f32 %v1002_v27, %v918_v24  ;;  %v798_v13 = vadd.f32 %v797_v17, %v3007_v7  ;;  %v1045_v30 = vpack.c.bf16 %v1033_v20, %v1032_v23  ;;  %v1006_v7 = vmul.f32 %v2532_v29, %v2950_v0  ;;  %2290 = vmatprep.subr.bf16.mxu0 %v2554_v21  ;;  %v2557_v23 = vld [vmem:[%s3364_s8 + $0x8] sm:$0xff]   ;;  %v2558_v24 = vld [vmem:[%s3364_s8 + $0x10] sm:$0xff]  }
 0x189   : > { %v1035_v37 = vmax.f32 %v1019_v2, 0.0  ;;  %v921_v31 = vadd.f32 %v3015_v18, %v803_v28  ;;  %v2538_v27 = vunpack.i.l.bf16 %v2537_v33  ;;  %v908_v1 = vmul.f32 %v2526_v6, %v2948_v56  ;;  %2291 = vmatpush3.bf16.msra.mxu0 %v2554_v21  ;;  %2343 = vmatprep.subr.bf16.mxu1 %v2557_v23  ;;  %v3098_v2 = vld [vmem:[%s3361_s5] ss:$0 sm:$0xff] }
 0x18a   : > { %v1034_v43 = vmax.f32 %v1018_v59, 0.0  ;;  %v920_v44 = vadd.f32 %v904_v42, %v798_v13  ;;  %v2242_v15 = vpop.f32.mrb[12].mxu0  ;;  %2267 = vmatmul.mubr.bf16.gmra.mrb[4].mxu1 %v1045_v30  ;;  %v909_v42 = vmul.f32 %v2527_v40, %v2948_v56 }
 0x18b   : > { %v1021_v48 = vadd.f32 %v1005_v46, %v921_v31  ;;  %v813_v26 = vadd.f32 %v2242_v15, %v629_v8  ;;  %v807_v49 = vpop.f32.mrb[13].mxu0  ;;  %v630_v46 = vmul.f32 %v2515_v35, %v2944_v55  ;;  %v1008_v62 = vmul.f32 %v2538_v27, %v2950_v0  ;;  %2351 = vmatpush3.bf16.msra.mxu1 %v2557_v23  ;;  %v3090_v8 = vld [vmem:[%s3364_s8 + $0x28] sm:$0xff]  }
 0x18c   : > { %v1020_v52 = vadd.f32 %v3026_v47, %v920_v44  ;;  %v808_v54 = vadd.f32 %v807_v49, %v628_v3  ;;  %v1046_v58 = vpack.c.bf16 %v1035_v37, %v1034_v43  ;;  %v1009_v47 = vmul.f32 %v2539_v51, %v2950_v0  ;;  %v2555_v0 = vld [vmem:[%s3362_s6 + $0x38] sm:$0xff]   ;;  %2344 = vmatprep.subr.bf16.mxu1 %v2558_v24 }
 0x18d   : > { %v1037_v18 = vmax.f32 %v1021_v48, 0.0  ;;  %v923_v45 = vadd.f32 %v907_v11, %v813_v26  ;;  %2292 = vmatprep.subr.bf16.mxu0 %v2555_v0 }
 0x18e   : > { %v1036_v60 = vmax.f32 %v1020_v52, 0.0  ;;  %v922_v61 = vadd.f32 %v906_v39, %v808_v54  ;;  %v2245_v63 = vpop.f32.mrb[14].mxu0  ;;  %2270 = vmatprep.mubr.bf16.mxu1 %v1046_v58  ;;  %2293 = vmatpush3.bf16.msra.mxu0 %v2555_v0 }
 0x18f   : > { %v1023_v36 = vadd.f32 %v1007_v32, %v923_v45  ;;  %v823_v53 = vadd.f32 %v2245_v63, %v631_v16  ;;  %v817_v50 = vpop.f32.mrb[15].mxu0  ;;  %2310 = vmatprep.subr.bf16.mxu0 %v2556_v22  ;;  %2352 = vmatpush3.bf16.msra.mxu1 %v2558_v24 }
 0x190   : > { %v1022_v38 = vadd.f32 %v1006_v7, %v922_v61  ;;  %v818_v5 = vadd.f32 %v817_v50, %v630_v46  ;;  %v1047_v4 = vpack.c.bf16 %v1037_v18, %v1036_v60  ;;  %2345 = vmatprep.subr.bf16.mxu1 %v3077_v25 }
 0x191   : > { %v1039_v9 = vmax.f32 %v1023_v36, 0.0  ;;  %v925_v34 = vadd.f32 %v909_v42, %v823_v53 }
 0x192   : > { %v1038_v10 = vmax.f32 %v1022_v38, 0.0  ;;  %v924_v12 = vadd.f32 %v908_v1, %v818_v5  ;;  %2271 = vmatmul.mubr.bf16.gmra.mrb[8].mxu1 %v1047_v4 }
 0x193   : > { %v1025_v14 = vadd.f32 %v1009_v47, %v925_v34  ;;  %2353 = vmatpush3.bf16.msra.mxu1 %v3077_v25 }
 0x194   : > { %v1024_v19 = vadd.f32 %v1008_v62, %v924_v12  ;;  %v1048_v55 = vpack.c.bf16 %v1039_v9, %v1038_v10  ;;  %2346 = vmatprep.subr.bf16.mxu1 %v3083_v41 }
 0x195   : > { %v1041_v20 = vmax.f32 %v1025_v14, 0.0 }
 0x196   : > { %v1040_v56 = vmax.f32 %v1024_v19, 0.0  ;;  %2274 = vmatprep.mubr.bf16.mxu1 %v1048_v55 }
 0x197   : > { %2354 = vmatpush3.bf16.msra.mxu1 %v3083_v41 }
 0x198   : > { %v1049_v35 = vpack.c.bf16 %v1041_v20, %v1040_v56  ;;  %2347 = vmatprep.subr.bf16.mxu1 %v3090_v8 }
 0x19a   : > { %2275 = vmatmul.mubr.bf16.gmra.mrb[12].mxu1 %v1049_v35 }
 0x19b   : > { %2355 = vmatpush3.bf16.msra.mxu1 %v3090_v8 }
 0x255   : > { %v2264_v28 = vpop.f32.mrb[0].mxu1 }
 0x256   : > { %v1164_v17 = vadd.f32 %v2264_v28, %v3098_v2  ;;  %v1155_v29 = vpop.f32.mrb[1].mxu1 }
 0x257   : > { %v1156_v3 = vadd.f32 %v3098_v2, %v1155_v29  ;;  %v2265_v59 = vpop.f32.mrb[2].mxu1 }
 0x258   : > { %v1167_v11 = vadd.f32 %v2265_v59, %v3098_v2  ;;  %v1158_v13 = vpop.f32.mrb[3].mxu1  ;;  %v1220_v33 = vmax.f32 %v1164_v17, 0.0 }
 0x259   : > { %v1159_v30 = vadd.f32 %v3098_v2, %v1158_v13  ;;  %v1218_v39 = vmax.f32 %v1156_v3, 0.0 }
 0x25a   : > { %v1221_v37 = vmax.f32 %v1167_v11, 0.0 }
 0x25b   : > { %v1219_v40 = vmax.f32 %v1159_v30, 0.0 }
 0x25c   : > { %v1235_v31 = vpack.c.bf16 %v1221_v37, %v1220_v33 }
 0x25d   : > { %v1234_v43 = vpack.c.bf16 %v1219_v40, %v1218_v39  ;;  %v2268_v6 = vpop.f32.mrb[4].mxu1 }
 0x25e   : > { %v1180_v44 = vadd.f32 %v2268_v6, %v3098_v2  ;;  %v1171_v32 = vpop.f32.mrb[5].mxu1 }
 0x25f   : > { %v1172_v15 = vadd.f32 %v3098_v2, %v1171_v32  ;;  %v2269_v48 = vpop.f32.mrb[6].mxu1  ;;  %2294 = vmatprep.mubr.bf16.mxu0 %v1234_v43 }
 0x260   : > { %v1183_v7 = vadd.f32 %v2269_v48, %v3098_v2  ;;  %v1174_v26 = vpop.f32.mrb[7].mxu1  ;;  %2295 = vmatmul.mubr.bf16.vlgmr.msra.gmra.mrb[16].mxu0 %v1235_v31  ;;  %v1224_v51 = vmax.f32 %v1180_v44, 0.0 }
 0x261   : > { %v1175_v49 = vadd.f32 %v3098_v2, %v1174_v26  ;;  %2311 = vmatpush3.bf16.msra.mxu0 %v2556_v22  ;;  %v1222_v54 = vmax.f32 %v1172_v15, 0.0  ;;  %v2562_v22 = vld [vmem:[%s3364_s8 + $0x30] sm:$0xff]  }
 0x262   : > { %v1225_v52 = vmax.f32 %v1183_v7, 0.0  ;;  %2312 = vmatprep.subr.bf16.mxu0 %v2557_v23  ;;  %2348 = vmatprep.subr.bf16.mxu1 %v2562_v22 }
 0x263   : > { %v1223_v27 = vmax.f32 %v1175_v49, 0.0  ;;  %2356 = vmatpush3.bf16.msra.mxu1 %v2562_v22 }
 0x264   : > { %v1237_v58 = vpack.c.bf16 %v1225_v52, %v1224_v51 }
 0x265   : > { %v1236_v18 = vpack.c.bf16 %v1223_v27, %v1222_v54  ;;  %v2272_v45 = vpop.f32.mrb[8].mxu1  ;;  %2313 = vmatpush3.bf16.msra.mxu0 %v2557_v23  ;;  %v2563_v23 = vld [vmem:[%s3364_s8 + $0x38] sm:$0xff]  }
 0x266   : > { %v1196_v16 = vadd.f32 %v2272_v45, %v3098_v2  ;;  %v1187_v42 = vpop.f32.mrb[9].mxu1  ;;  %2314 = vmatprep.subr.bf16.mxu0 %v2558_v24  ;;  %2349 = vmatprep.subr.bf16.mxu1 %v2563_v23 }
 0x267   : > { %v1188_v60 = vadd.f32 %v3098_v2, %v1187_v42  ;;  %v2273_v61 = vpop.f32.mrb[10].mxu1  ;;  %2298 = vmatprep.mubr.bf16.mxu0 %v1236_v18  ;;  %2357 = vmatpush3.bf16.msra.mxu1 %v2563_v23 }
 0x268   : > { %v1199_v63 = vadd.f32 %v2273_v61, %v3098_v2  ;;  %v1190_v46 = vpop.f32.mrb[11].mxu1  ;;  %2299 = vmatmul.mubr.bf16.gmra.mrb[20].mxu0 %v1237_v58  ;;  %v1228_v36 = vmax.f32 %v1196_v16, 0.0 }
 0x269   : > { %v1191_v1 = vadd.f32 %v3098_v2, %v1190_v46  ;;  %2315 = vmatpush3.bf16.msra.mxu0 %v2558_v24  ;;  %v1226_v47 = vmax.f32 %v1188_v60, 0.0  ;;  %v2013_v24 = vld [vmem:[%s3363_s7] ss:$0 sm:$0xff] }
 0x26a   : > { %v1229_v53 = vmax.f32 %v1199_v63, 0.0  ;;  %2316 = vmatprep.subr.bf16.mxu0 %v3077_v25 }
 0x26b   : > { %v1227_v50 = vmax.f32 %v1191_v1, 0.0 }
 0x26c   : > { %v1239_v38 = vpack.c.bf16 %v1229_v53, %v1228_v36 }
 0x26d   : > { %v1238_v62 = vpack.c.bf16 %v1227_v50, %v1226_v47  ;;  %v2276_v5 = vpop.f32.mrb[12].mxu1  ;;  %2317 = vmatpush3.bf16.msra.mxu0 %v3077_v25 }
 0x26e   : > { %v1212_v4 = vadd.f32 %v2276_v5, %v3098_v2  ;;  %v1203_v9 = vpop.f32.mrb[13].mxu1  ;;  %2318 = vmatprep.subr.bf16.mxu0 %v3083_v41 }
 0x26f   : > { %v1204_v34 = vadd.f32 %v3098_v2, %v1203_v9  ;;  %v2277_v10 = vpop.f32.mrb[14].mxu1  ;;  %2302 = vmatprep.mubr.bf16.mxu0 %v1238_v62 }
 0x270   : > { %v1215_v12 = vadd.f32 %v2277_v10, %v3098_v2  ;;  %v1206_v14 = vpop.f32.mrb[15].mxu1  ;;  %2303 = vmatmul.mubr.bf16.gmra.mrb[24].mxu0 %v1239_v38  ;;  %v1232_v55 = vmax.f32 %v1212_v4, 0.0 }
 0x271   : > { %v1207_v19 = vadd.f32 %v3098_v2, %v1206_v14  ;;  %2319 = vmatpush3.bf16.msra.mxu0 %v3083_v41  ;;  %v1230_v56 = vmax.f32 %v1204_v34, 0.0 }
 0x272   : > { %v1233_v20 = vmax.f32 %v1215_v12, 0.0  ;;  %2320 = vmatprep.subr.bf16.mxu0 %v3090_v8 }
 0x273   : > { %v1231_v35 = vmax.f32 %v1207_v19, 0.0 }
 0x274   : > { %v1241_v21 = vpack.c.bf16 %v1233_v20, %v1232_v55 }
 0x275   : > { %v1240_v0 = vpack.c.bf16 %v1231_v35, %v1230_v56  ;;  %2321 = vmatpush3.bf16.msra.mxu0 %v3090_v8  ;;  %v2022_v56 = vld [vmem:[%s3365_s9] ss:$0 sm:$0xff] }
 0x276   : > { %2322 = vmatprep.subr.bf16.mxu0 %v2562_v22 }
 0x277   : > { %2306 = vmatprep.mubr.bf16.mxu0 %v1240_v0 }
 0x278   : > { %2307 = vmatmul.mubr.bf16.gmra.mrb[28].mxu0 %v1241_v21 }
 0x279   : > { %2323 = vmatpush3.bf16.msra.mxu0 %v2562_v22 }
 0x27a   : > { %2324 = vmatprep.subr.bf16.mxu0 %v2563_v23 }
 0x27d   : > { %2325 = vmatpush3.bf16.msra.mxu0 %v2563_v23 }
 0x333   : > { %v2296_v25 = vpop.f32.mrb[16].mxu0 }
 0x334   : > { %v1356_v41 = vadd.f32 %v2296_v25, %v2013_v24  ;;  %v1347_v8 = vpop.f32.mrb[17].mxu0 }
 0x335   : > { %v1348_v2 = vadd.f32 %v2013_v24, %v1347_v8  ;;  %v2297_v28 = vpop.f32.mrb[18].mxu0 }
 0x336   : > { %v1359_v17 = vadd.f32 %v2297_v28, %v2013_v24  ;;  %v1350_v29 = vpop.f32.mrb[19].mxu0  ;;  %v1412_v59 = vmax.f32 %v1356_v41, 0.0 }
 0x337   : > { %v1351_v3 = vadd.f32 %v2013_v24, %v1350_v29  ;;  %v1410_v13 = vmax.f32 %v1348_v2, 0.0 }
 0x338   : > { %v1413_v11 = vmax.f32 %v1359_v17, 0.0 }
 0x339   : > { %v1411_v30 = vmax.f32 %v1351_v3, 0.0 }
 0x33a   : > { %v1427_v33 = vpack.c.bf16 %v1413_v11, %v1412_v59 }
 0x33b   : > { %v1426_v37 = vpack.c.bf16 %v1411_v30, %v1410_v13  ;;  %v2300_v39 = vpop.f32.mrb[20].mxu0 }
 0x33c   : > { %v1372_v40 = vadd.f32 %v2300_v39, %v2013_v24  ;;  %v1363_v31 = vpop.f32.mrb[21].mxu0 }
 0x33d   : > { %v1364_v43 = vadd.f32 %v2013_v24, %v1363_v31  ;;  %v2301_v6 = vpop.f32.mrb[22].mxu0  ;;  %2326 = vmatprep.mubr.bf16.mxu0 %v1426_v37 }
 0x33e   : > { %v1375_v44 = vadd.f32 %v2301_v6, %v2013_v24  ;;  %v1366_v32 = vpop.f32.mrb[23].mxu0  ;;  %2327 = vmatmul.mubr.bf16.vlgmr.msra.gmra.mrb[32].mxu0 %v1427_v33  ;;  %v1416_v48 = vmax.f32 %v1372_v40, 0.0 }
 0x33f   : > { %v1367_v15 = vadd.f32 %v2013_v24, %v1366_v32  ;;  %v1414_v26 = vmax.f32 %v1364_v43, 0.0 }
 0x340   : > { %v1417_v7 = vmax.f32 %v1375_v44, 0.0 }
 0x341   : > { %v1415_v49 = vmax.f32 %v1367_v15, 0.0 }
 0x342   : > { %v1429_v51 = vpack.c.bf16 %v1417_v7, %v1416_v48 }
 0x343   : > { %v1428_v52 = vpack.c.bf16 %v1415_v49, %v1414_v26  ;;  %v2304_v54 = vpop.f32.mrb[24].mxu0 }
 0x344   : > { %v1388_v27 = vadd.f32 %v2304_v54, %v2013_v24  ;;  %v1379_v58 = vpop.f32.mrb[25].mxu0 }
 0x345   : > { %v1380_v18 = vadd.f32 %v2013_v24, %v1379_v58  ;;  %v2305_v45 = vpop.f32.mrb[26].mxu0  ;;  %2330 = vmatprep.mubr.bf16.mxu1 %v1428_v52 }
 0x346   : > { %v1391_v16 = vadd.f32 %v2305_v45, %v2013_v24  ;;  %v1382_v42 = vpop.f32.mrb[27].mxu0  ;;  %2331 = vmatmul.mubr.bf16.vlgmr.msra.gmra.mrb[16].mxu1 %v1429_v51  ;;  %v1420_v61 = vmax.f32 %v1388_v27, 0.0 }
 0x347   : > { %v1383_v60 = vadd.f32 %v2013_v24, %v1382_v42  ;;  %v1418_v46 = vmax.f32 %v1380_v18, 0.0 }
 0x348   : > { %v1421_v63 = vmax.f32 %v1391_v16, 0.0 }
 0x349   : > { %v1419_v1 = vmax.f32 %v1383_v60, 0.0 }
 0x34a   : > { %v1431_v36 = vpack.c.bf16 %v1421_v63, %v1420_v61 }
 0x34b   : > { %v1430_v53 = vpack.c.bf16 %v1419_v1, %v1418_v46  ;;  %v2308_v47 = vpop.f32.mrb[28].mxu0 }
 0x34c   : > { %v1404_v50 = vadd.f32 %v2308_v47, %v2013_v24  ;;  %v1395_v38 = vpop.f32.mrb[29].mxu0 }
 0x34d   : > { %v1396_v62 = vadd.f32 %v2013_v24, %v1395_v38  ;;  %v2309_v5 = vpop.f32.mrb[30].mxu0  ;;  %2334 = vmatprep.mubr.bf16.mxu1 %v1430_v53 }
 0x34e   : > { %v1407_v4 = vadd.f32 %v2309_v5, %v2013_v24  ;;  %v1398_v9 = vpop.f32.mrb[31].mxu0  ;;  %2335 = vmatmul.mubr.bf16.gmra.mrb[20].mxu1 %v1431_v36  ;;  %v1424_v10 = vmax.f32 %v1404_v50, 0.0 }
 0x34f   : > { %v1399_v34 = vadd.f32 %v2013_v24, %v1398_v9  ;;  %v1422_v14 = vmax.f32 %v1396_v62, 0.0 }
 0x350   : > { %v1425_v12 = vmax.f32 %v1407_v4, 0.0 }
 0x351   : > { %v1423_v19 = vmax.f32 %v1399_v34, 0.0 }
 0x352   : > { %v1433_v55 = vpack.c.bf16 %v1425_v12, %v1424_v10 }
 0x353   : > { %v1432_v20 = vpack.c.bf16 %v1423_v19, %v1422_v14 }
 0x355   : > { %2338 = vmatprep.mubr.bf16.mxu1 %v1432_v20 }
 0x356   : > { %2339 = vmatmul.mubr.bf16.gmra.mrb[24].mxu1 %v1433_v55 }
 0x411   : > { %v2328_v35 = vpop.f32.mrb[32].mxu0 }
 0x412   : > { %v1548_v21 = vadd.f32 %v2328_v35, %v2022_v56  ;;  %v1539_v0 = vpop.f32.mrb[33].mxu0 }
 0x413   : > { %v2329_v22 = vpop.f32.mrb[34].mxu0  ;;  %v1540_v23 = vadd.f32 %v2022_v56, %v1539_v0 }
 0x414   : > { %v1551_v24 = vadd.f32 %v2329_v22, %v2022_v56  ;;  %v1542_v25 = vpop.f32.mrb[35].mxu0  ;;  %v1605_v41 = vsel %vm1602_vm0, %v1548_v21, -1e+30 }
 0x415   : > { %1623 = vmax.xlane.f32.xlu1 %v1605_v41  ;;  %v1543_v8 = vadd.f32 %v2022_v56, %v1542_v25  ;;  %v1603_v28 = vsel %vm1602_vm0, %v1540_v23, -1e+30 }
 0x416   : > { %v1606_v2 = vsel %vm1602_vm0, %v1551_v24, -1e+30 }
 0x417   : > { %1625 = vmax.xlane.f32.xlu0 %v1606_v2  ;;  %v1604_v59 = vsel %vm1602_vm0, %v1543_v8, -1e+30 }
 0x419   : > { %v2332_v17 = vpop.f32.mrb[16].mxu1  ;;  %1619 = vmax.xlane.f32.xlu1 %v1603_v28 }
 0x41a   : > { %v1564_v29 = vadd.f32 %v2332_v17, %v2022_v56  ;;  %v1555_v3 = vpop.f32.mrb[17].mxu1 }
 0x41b   : > { %v2333_v11 = vpop.f32.mrb[18].mxu1  ;;  %1621 = vmax.xlane.f32.xlu0 %v1604_v59  ;;  %v1556_v13 = vadd.f32 %v2022_v56, %v1555_v3 }
 0x41c   : > { %v1567_v30 = vadd.f32 %v2333_v11, %v2022_v56  ;;  %v1558_v33 = vpop.f32.mrb[19].mxu1  ;;  %v1609_v37 = vsel %vm1602_vm0, %v1564_v29, -1e+30 }
 0x41d   : > { %1631 = vmax.xlane.f32.xlu1 %v1609_v37  ;;  %v1559_v39 = vadd.f32 %v2022_v56, %v1558_v33  ;;  %v1607_v31 = vsel %vm1602_vm0, %v1556_v13, -1e+30 }
 0x41e   : > { %v1610_v40 = vsel %vm1602_vm0, %v1567_v30, -1e+30 }
 0x41f   : > { %1633 = vmax.xlane.f32.xlu0 %v1610_v40  ;;  %v1608_v32 = vsel %vm1602_vm0, %v1559_v39, -1e+30 }
 0x421   : > { %v2336_v43 = vpop.f32.mrb[20].mxu1  ;;  %1627 = vmax.xlane.f32.xlu1 %v1607_v31 }
 0x422   : > { %v1580_v6 = vadd.f32 %v2336_v43, %v2022_v56  ;;  %v1571_v44 = vpop.f32.mrb[21].mxu1 }
 0x423   : > { %v2337_v15 = vpop.f32.mrb[22].mxu1  ;;  %1629 = vmax.xlane.f32.xlu0 %v1608_v32  ;;  %v1572_v48 = vadd.f32 %v2022_v56, %v1571_v44 }
 0x424   : > { %v1583_v7 = vadd.f32 %v2337_v15, %v2022_v56  ;;  %v1574_v26 = vpop.f32.mrb[23].mxu1  ;;  %v1613_v49 = vsel %vm1602_vm0, %v1580_v6, -1e+30 }
 0x425   : > { %1639 = vmax.xlane.f32.xlu1 %v1613_v49  ;;  %v1575_v51 = vadd.f32 %v2022_v56, %v1574_v26  ;;  %v3160_v54 = vsel %vm1602_vm0, %v1572_v48, -1e+30 }
 0x426   : > { %v3155_v52 = vsel %vm1602_vm0, %v1583_v7, -1e+30 }
 0x427   : > { %1641 = vmax.xlane.f32.xlu0 %v3155_v52  ;;  %v3165_v18 = vsel %vm1602_vm0, %v1575_v51, -1e+30 }
 0x429   : > { %v2340_v27 = vpop.f32.mrb[24].mxu1  ;;  %1635 = vmax.xlane.f32.xlu1 %v3160_v54 }
 0x42a   : > { %v1587_v58 = vpop.f32.mrb[25].mxu1  ;;  %v1596_v60 = vadd.f32 %v2340_v27, %v2022_v56 }
 0x42b   : > { %v1588_v45 = vadd.f32 %v2022_v56, %v1587_v58  ;;  %v2341_v16 = vpop.f32.mrb[26].mxu1  ;;  %1637 = vmax.xlane.f32.xlu0 %v3165_v18 }
 0x42c   : > { %v1590_v42 = vpop.f32.mrb[27].mxu1  ;;  %v1599_v46 = vadd.f32 %v2341_v16, %v2022_v56  ;;  %v3180_v36 = vsel %vm1602_vm0, %v1596_v60, -1e+30 }
 0x42d   : > { %v1591_v61 = vadd.f32 %v2022_v56, %v1590_v42  ;;  %v3170_v63 = vsel %vm1602_vm0, %v1588_v45, -1e+30 }
 0x42e   : > { %1643 = vmax.xlane.f32.xlu1 %v3170_v63  ;;  %v3185_v53 = vsel %vm1602_vm0, %v1599_v46, -1e+30 }
 0x42f   : > { %v3175_v1 = vsel %vm1602_vm0, %v1591_v61, -1e+30 }
 0x430   : > { %1645 = vmax.xlane.f32.xlu0 %v3175_v1 }
 0x432   : > { %1647 = vmax.xlane.f32.xlu1 %v3180_v36 }
 0x434   : > { %1649 = vmax.xlane.f32.xlu0 %v3185_v53 }
 0x4a2   : > { %v1624_v47 = vpop.xlane.xlu1 %1623 }
 0x4a3   : > { %v3188_v50 = vsub.f32 %v1605_v41, %v1624_v47 }
 0x4a4   : > { %v1626_v38 = vpop.xlane.xlu0 %1625 }
 0x4a5   : > { %v1671_v62 = vmul.f32 1.442695, %v3188_v50  ;;  %v3191_v5 = vsub.f32 %v1606_v2, %v1626_v38 }
 0x4a6   : > { %v1620_v4 = vpop.xlane.xlu1 %1619 }
 0x4a7   : > { %2564 = vpow2.f32 %v1671_v62  ;;  %v1673_v9 = vmul.f32 1.442695, %v3191_v5  ;;  %v3194_v34 = vsub.f32 %v1603_v28, %v1620_v4 }
 0x4a8   : > { %v1622_v10 = vpop.xlane.xlu0 %1621 }
 0x4a9   : > { %2566 = vpow2.f32 %v1673_v9  ;;  %v1667_v12 = vmul.f32 1.442695, %v3194_v34  ;;  %v3197_v14 = vsub.f32 %v1604_v59, %v1622_v10 }
 0x4aa   : > { %v1632_v19 = vpop.xlane.xlu1 %1631 }
 0x4ab   : > { %2568 = vpow2.f32 %v1667_v12  ;;  %v1669_v55 = vmul.f32 1.442695, %v3197_v14  ;;  %v3200_v20 = vsub.f32 %v1609_v37, %v1632_v19 }
 0x4ac   : > { %v1634_v56 = vpop.xlane.xlu0 %1633 }
 0x4ad   : > { %2570 = vpow2.f32 %v1669_v55  ;;  %v1679_v35 = vmul.f32 1.442695, %v3200_v20  ;;  %v3203_v21 = vsub.f32 %v1610_v40, %v1634_v56 }
 0x4ae   : > { %v1628_v0 = vpop.xlane.xlu1 %1627 }
 0x4af   : > { %2572 = vpow2.f32 %v1679_v35  ;;  %v1681_v22 = vmul.f32 1.442695, %v3203_v21  ;;  %v3206_v23 = vsub.f32 %v1607_v31, %v1628_v0 }
 0x4b0   : > { %v1630_v24 = vpop.xlane.xlu0 %1629 }
 0x4b1   : > { %v2565_v25 = vpop.eup %2564  ;;  %2574 = vpow2.f32 %v1681_v22  ;;  %v1675_v41 = vmul.f32 1.442695, %v3206_v23  ;;  %v3209_v8 = vsub.f32 %v1608_v32, %v1630_v24 }
 0x4b2   : > { %v1640_v2 = vpop.xlane.xlu1 %1639  ;;  %v1701_v28 = vsel %vm1602_vm0, %v2565_v25, 0.0 }
 0x4b3   : > { %v2567_v17 = vpop.eup %2566  ;;  %2576 = vpow2.f32 %v1675_v41  ;;  %v1677_v29 = vmul.f32 1.442695, %v3209_v8  ;;  %v3214_v3 = vsub.f32 %v1613_v49, %v1640_v2  ;;  %1719 = vadd.xlane.f32.xlu1 %v1701_v28 }
 0x4b4   : > { %v1642_v59 = vpop.xlane.xlu0 %1641  ;;  %v1702_v11 = vsel %vm1602_vm0, %v2567_v17, 0.0 }
 0x4b5   : > { %v2569_v13 = vpop.eup %2568  ;;  %2578 = vpow2.f32 %v1677_v29  ;;  %v1687_v30 = vmul.f32 1.442695, %v3214_v3  ;;  %v3220_v33 = vsub.f32 %v3155_v52, %v1642_v59  ;;  %1721 = vadd.xlane.f32.xlu0 %v1702_v11 }
 0x4b6   : > { %v1636_v37 = vpop.xlane.xlu1 %1635  ;;  %v1699_v39 = vsel %vm1602_vm0, %v2569_v13, 0.0 }
 0x4b7   : > { %v2571_v40 = vpop.eup %2570  ;;  %2580 = vpow2.f32 %v1687_v30  ;;  %v1689_v31 = vmul.f32 1.442695, %v3220_v33  ;;  %v3226_v43 = vsub.f32 %v3160_v54, %v1636_v37  ;;  %1715 = vadd.xlane.f32.xlu1 %v1699_v39 }
 0x4b8   : > { %v1638_v6 = vpop.xlane.xlu0 %1637  ;;  %v1700_v44 = vsel %vm1602_vm0, %v2571_v40, 0.0 }
 0x4b9   : > { %v2573_v32 = vpop.eup %2572  ;;  %2582 = vpow2.f32 %v1689_v31  ;;  %v1683_v15 = vmul.f32 1.442695, %v3226_v43  ;;  %v3232_v48 = vsub.f32 %v3165_v18, %v1638_v6  ;;  %1717 = vadd.xlane.f32.xlu0 %v1700_v44 }
 0x4ba   : > { %v1705_v7 = vsel %vm1602_vm0, %v2573_v32, 0.0 }
 0x4bb   : > { %v2575_v26 = vpop.eup %2574  ;;  %2584 = vpow2.f32 %v1683_v15  ;;  %v1685_v49 = vmul.f32 1.442695, %v3232_v48  ;;  %1727 = vadd.xlane.f32.xlu1 %v1705_v7  ;;  %v1644_v51 = vpop.xlane.xlu1 %1643 }
 0x4bc   : > { %v3238_v52 = vsub.f32 %v3170_v63, %v1644_v51  ;;  %v1706_v54 = vsel %vm1602_vm0, %v2575_v26, 0.0 }
 0x4bd   : > { %v2577_v27 = vpop.eup %2576  ;;  %2586 = vpow2.f32 %v1685_v49  ;;  %1729 = vadd.xlane.f32.xlu0 %v1706_v54  ;;  %v1646_v58 = vpop.xlane.xlu0 %1645 }
 0x4be   : > { %v1691_v18 = vmul.f32 1.442695, %v3238_v52  ;;  %v3244_v45 = vsub.f32 %v3175_v1, %v1646_v58  ;;  %v1703_v16 = vsel %vm1602_vm0, %v2577_v27, 0.0 }
 0x4bf   : > { %v2579_v42 = vpop.eup %2578  ;;  %1723 = vadd.xlane.f32.xlu1 %v1703_v16  ;;  %v1648_v60 = vpop.xlane.xlu1 %1647 }
 0x4c0   : > { %2588 = vpow2.f32 %v1691_v18  ;;  %v1693_v61 = vmul.f32 1.442695, %v3244_v45  ;;  %v3250_v63 = vsub.f32 %v3180_v36, %v1648_v60  ;;  %v1704_v46 = vsel %vm1602_vm0, %v2579_v42, 0.0 }
 0x4c1   : > { %v2581_v47 = vpop.eup %2580  ;;  %1725 = vadd.xlane.f32.xlu0 %v1704_v46  ;;  %v1650_v38 = vpop.xlane.xlu0 %1649 }
 0x4c2   : > { %2590 = vpow2.f32 %v1693_v61  ;;  %v1695_v1 = vmul.f32 1.442695, %v3250_v63  ;;  %v3256_v62 = vsub.f32 %v3185_v53, %v1650_v38  ;;  %v1709_v4 = vsel %vm1602_vm0, %v2581_v47, 0.0 }
 0x4c3   : > { %v2583_v9 = vpop.eup %2582  ;;  %1735 = vadd.xlane.f32.xlu1 %v1709_v4 }
 0x4c4   : > { %2592 = vpow2.f32 %v1695_v1  ;;  %v1697_v36 = vmul.f32 1.442695, %v3256_v62  ;;  %v1710_v10 = vsel %vm1602_vm0, %v2583_v9, 0.0 }
 0x4c5   : > { %v2585_v12 = vpop.eup %2584  ;;  %1737 = vadd.xlane.f32.xlu0 %v1710_v10 }
 0x4c6   : > { %2594 = vpow2.f32 %v1697_v36  ;;  %v1707_v19 = vsel %vm1602_vm0, %v2585_v12, 0.0 }
 0x4c7   : > { %v2587_v55 = vpop.eup %2586  ;;  %1731 = vadd.xlane.f32.xlu1 %v1707_v19 }
 0x4c8   : > { %v1708_v53 = vsel %vm1602_vm0, %v2587_v55, 0.0 }
 0x4c9   : > { %1733 = vadd.xlane.f32.xlu0 %v1708_v53 }
 0x4ca   : > { %v2589_v56 = vpop.eup %2588 }
 0x4cb   : > { %v1711_v35 = vsel %vm1602_vm0, %v2589_v56, 0.0 }
 0x4cc   : > { %v2591_v0 = vpop.eup %2590  ;;  %1739 = vadd.xlane.f32.xlu1 %v1711_v35 }
 0x4cd   : > { %v1712_v22 = vsel %vm1602_vm0, %v2591_v0, 0.0 }
 0x4ce   : > { %v2593_v24 = vpop.eup %2592  ;;  %1741 = vadd.xlane.f32.xlu0 %v1712_v22 }
 0x4cf   : > { %v1713_v25 = vsel %vm1602_vm0, %v2593_v24, 0.0 }
 0x4d0   : > { %v2595_v41 = vpop.eup %2594  ;;  %1743 = vadd.xlane.f32.xlu1 %v1713_v25 }
 0x4d1   : > { %v1714_v2 = vsel %vm1602_vm0, %v2595_v41, 0.0 }
 0x4d2   : > { %1745 = vadd.xlane.f32.xlu0 %v1714_v2 }
 0x540   : > { %v1720_v28 = vpop.xlane.xlu1 %1719 }
 0x541   : > { %2596 = vlog2.f32 %v1720_v28 }
 0x542   : > { %v1722_v17 = vpop.xlane.xlu0 %1721 }
 0x543   : > { %2598 = vlog2.f32 %v1722_v17 }
 0x544   : > { %v1716_v29 = vpop.xlane.xlu1 %1715 }
 0x545   : > { %2600 = vlog2.f32 %v1716_v29 }
 0x546   : > { %v1718_v59 = vpop.xlane.xlu0 %1717 }
 0x547   : > { %2602 = vlog2.f32 %v1718_v59 }
 0x548   : > { %v1728_v11 = vpop.xlane.xlu1 %1727 }
 0x549   : > { %2604 = vlog2.f32 %v1728_v11 }
 0x54a   : > { %v1730_v13 = vpop.xlane.xlu0 %1729 }
 0x54b   : > { %v2597_v30 = vpop.eup %2596  ;;  %2606 = vlog2.f32 %v1730_v13 }
 0x54c   : > { %v1752_v37 = vmul.f32 0.6931472, %v2597_v30  ;;  %v1724_v39 = vpop.xlane.xlu1 %1723 }
 0x54d   : > { %v2599_v57 = vpop.eup %2598  ;;  %2608 = vlog2.f32 %v1724_v39 }
 0x54e   : > { %v1754_v40 = vmul.f32 0.6931472, %v2599_v57  ;;  %v1726_v31 = vpop.xlane.xlu0 %1725  ;;  %v1781_v44 = vsub.f32 %v3188_v50, %v1752_v37 }
 0x54f   : > { %v2601_v6 = vpop.eup %2600  ;;  %2610 = vlog2.f32 %v1726_v31 }
 0x550   : > { %v1782_v32 = vsub.f32 %v3191_v5, %v1754_v40  ;;  %v1748_v15 = vmul.f32 0.6931472, %v2601_v6  ;;  %v1736_v7 = vpop.xlane.xlu1 %1735 }
 0x551   : > { %v2603_v26 = vpop.eup %2602  ;;  %2612 = vlog2.f32 %v1736_v7 }
 0x552   : > { %v2109_v49 = vpack.c.bf16 %v1782_v32, %v1781_v44  ;;  %v1750_v51 = vmul.f32 0.6931472, %v2603_v26  ;;  %v1738_v54 = vpop.xlane.xlu0 %1737  ;;  %v1779_v58 = vsub.f32 %v3194_v34, %v1748_v15 }
 0x553   : > { %v2605_v27 = vpop.eup %2604  ;;  %2614 = vlog2.f32 %v1738_v54 }
 0x554   : > { %2148 = vst [vmem:[%s3280_s28 + $0x8] sm:$0xff] %v2109_v49   ;;  %v1780_v50 = vsub.f32 %v3197_v14, %v1750_v51  ;;  %v1760_v18 = vmul.f32 0.6931472, %v2605_v27  ;;  %v1732_v5 = vpop.xlane.xlu1 %1731 }
 0x555   : > { %v2607_v16 = vpop.eup %2606  ;;  %2616 = vlog2.f32 %v1732_v5 }
 0x556   : > { %v2104_v42 = vpack.c.bf16 %v1780_v50, %v1779_v58  ;;  %v1762_v60 = vmul.f32 0.6931472, %v2607_v16  ;;  %v1734_v61 = vpop.xlane.xlu0 %1733  ;;  %v1785_v47 = vsub.f32 %v3200_v20, %v1760_v18 }
 0x557   : > { %v2609_v46 = vpop.eup %2608  ;;  %2618 = vlog2.f32 %v1734_v61 }
 0x558   : > { %2105 = vst [vmem:[%s3280_s28] sm:$0xff] %v2104_v42   ;;  %v1786_v38 = vsub.f32 %v3203_v21, %v1762_v60  ;;  %v1756_v1 = vmul.f32 0.6931472, %v2609_v46 }
 0x559   : > { %v2611_v4 = vpop.eup %2610  ;;  %v1740_v34 = vpop.xlane.xlu1 %1739 }
 0x55a   : > { %v2119_v9 = vpack.c.bf16 %v1786_v38, %v1785_v47  ;;  %v1758_v14 = vmul.f32 0.6931472, %v2611_v4  ;;  %2620 = vlog2.f32 %v1740_v34  ;;  %v1783_v12 = vsub.f32 %v3206_v23, %v1756_v1 }
 0x55b   : > { %v2613_v36 = vpop.eup %2612  ;;  %v1742_v10 = vpop.xlane.xlu0 %1741 }
 0x55c   : > { %2150 = vst [vmem:[%s3280_s28 + $0x18] sm:$0xff] %v2119_v9   ;;  %v1784_v19 = vsub.f32 %v3209_v8, %v1758_v14  ;;  %v1768_v55 = vmul.f32 0.6931472, %v2613_v36  ;;  %2622 = vlog2.f32 %v1742_v10 }
 0x55d   : > { %v2615_v53 = vpop.eup %2614  ;;  %v1744_v20 = vpop.xlane.xlu1 %1743 }
 0x55e   : > { %v2114_v21 = vpack.c.bf16 %v1784_v19, %v1783_v12  ;;  %v1770_v56 = vmul.f32 0.6931472, %v2615_v53  ;;  %2624 = vlog2.f32 %v1744_v20  ;;  %v1789_v22 = vsub.f32 %v3214_v3, %v1768_v55 }
 0x55f   : > { %v2617_v35 = vpop.eup %2616  ;;  %v1746_v0 = vpop.xlane.xlu0 %1745 }
 0x560   : > { %2149 = vst [vmem:[%s3280_s28 + $0x10] sm:$0xff] %v2114_v21   ;;  %v1790_v24 = vsub.f32 %v3220_v33, %v1770_v56  ;;  %v1764_v25 = vmul.f32 0.6931472, %v2617_v35  ;;  %2626 = vlog2.f32 %v1746_v0 }
 0x561   : > { %v2619_v23 = vpop.eup %2618 }
 0x562   : > { %v2129_v8 = vpack.c.bf16 %v1790_v24, %v1789_v22  ;;  %v1766_v41 = vmul.f32 0.6931472, %v2619_v23  ;;  %v1787_v28 = vsub.f32 %v3226_v43, %v1764_v25 }
 0x564   : > { %v2621_v2 = vpop.eup %2620  ;;  %2152 = vst [vmem:[%s3280_s28 + $0x28] sm:$0xff] %v2129_v8   ;;  %v1788_v17 = vsub.f32 %v3232_v48, %v1766_v41 }
 0x565   : > { %v1772_v29 = vmul.f32 0.6931472, %v2621_v2 }
 0x566   : > { %v2623_v59 = vpop.eup %2622  ;;  %v2124_v3 = vpack.c.bf16 %v1788_v17, %v1787_v28 }
 0x567   : > { %v1774_v11 = vmul.f32 0.6931472, %v2623_v59  ;;  %v1791_v33 = vsub.f32 %v3238_v52, %v1772_v29 }
 0x568   : > { %v2625_v13 = vpop.eup %2624  ;;  %2151 = vst [vmem:[%s3280_s28 + $0x20] sm:$0xff] %v2124_v3  }
 0x569   : > { %v1792_v30 = vsub.f32 %v3244_v45, %v1774_v11  ;;  %v1776_v37 = vmul.f32 0.6931472, %v2625_v13 }
 0x56a   : > { %v2627_v39 = vpop.eup %2626 }
 0x56b   : > { %v2134_v57 = vpack.c.bf16 %v1792_v30, %v1791_v33  ;;  %v1778_v43 = vmul.f32 0.6931472, %v2627_v39  ;;  %v1793_v48 = vsub.f32 %v3250_v63, %v1776_v37 }
 0x56d   : > { %2153 = vst [vmem:[%s3280_s28 + $0x30] sm:$0xff] %v2134_v57   ;;  %v1794_v40 = vsub.f32 %v3256_v62, %v1778_v43 }
 0x56f   : > { %v2139_v52 = vpack.c.bf16 %v1794_v40, %v1793_v48 }
 0x571   : > { %2154 = vst [vmem:[%s3280_s28 + $0x38] sm:$0xff] %v2139_v52  }
 0x572   : > { %2641 = shalt.err (!%p2638_p3)
}
 0x573   : > { %s2642_s26 = scalar_lea.hbm %s3308_s18, 1024  ;;  %s2646_s11 = scalar_lea.hbm %s3366_s10, 2048 }
 0x574   : > { %p2643_p4 = scmp.ne.s32.totalorder %s3308_s18, %s2642_s26  ;;  %p2647_p9 = scmp.lt.u32.totalorder %s3308_s18, %s3366_s10 }
 0x575   : > { %p2648_p10 = scmp.lt.u32.totalorder %s2646_s11, %s2642_s26  ;;  %p2650_p12 = scmp.lt.u32.totalorder %s2642_s26, %s3308_s18 }
 0x576   : > { %p2644_p7 = pnand %p2643_p4, %p2792_p5 }
 0x577   : > { %p2649_p11 = por %p2648_p10, %p2647_p9 }
 0x578   : > { %p2645_p8 = pneg %p2644_p7 }
 0x579   : > { %p2651_p13 = por %p2650_p12, %p2649_p11 }
 0x57b   : > { %p2652_p0 = pnand %p2651_p13, %p2645_p8 }
 0x57d   : > { %2655 = shalt.err (!%p2652_p0)
}
 0x57e   : > { %s2697_s20 = smov 64   ;;  %s2698_s25 = smov 4  }
 0x57f   : > { %2358 = dma.vmem_to_hbm [thread:$0]  (%p2792_p5), %s3310_s30, 1024, %s3308_s18, %s3315_s17, %s2697_s20, %s2697_s20, %s2698_s25  }
 0x580 PF: > { %p2364_p1 = scmp.ge.s32.totalorder %s2690_s16, 2  ;;  %s1904_s27 = sand.u32 1, %s2678_s13  }
 0x581   : > { %s1905_s26 = scalar_lea.sflag [#allocation3], %s1904_s27 }
 0x582   : > { %p2361_p2 = pnand %p2364_p1, %p2796_p6 }
 0x584   : > { %2673 = dma.done.wait (!%p2361_p2), %s1905_s26, 1024  }
 0x585   : > { %2675 = vsyncadd (!%p2361_p2), %s1905_s26, 4294966272  ;;  %p20_p3 = scmp.ge.s32.totalorder %s2779_s19, 4   ;;  %s3369_s13 = smov %s2682_s14 }
 0x586   : > { %s3370_s14 = smov %s2686_s15  ;;  %s3371_s15 = smov %s2790_s22 }
 0x587   : > { %s3372_s16 = smov %s2779_s19  ;;  %22 = sbr.rel (!%p20_p3) target bundleno = 3 (0x3), region = 98 }
 0x58e   :  { %1910 = vsyncpa [#allocation3], 1 }
 0x58f   :  { %1912 = vsyncpa [#allocation3 + $0x1], 1 }

</bundles_post_ra>
